<compile_context>
chip_gen: v7x
topology: tpu7x:2x2x1
jax: 0.10.0
libtpu: 0.0.40
codegen_flags: <defaults>
</compile_context>

<pallas_src>
import math
import functools

import jax
import jax.numpy as jnp
from jax import lax
from jax.experimental import pallas as pl
from jax.experimental.pallas import tpu as pltpu


_MASK_VAL = -1e30   # score for masked entries (exp(MASK - m) underflows to exactly 0)
_INIT_M = -1e9      # initial running max; >> _MASK_VAL so fully-masked rows contribute 0


def _vmem_limit_bytes():
    """Generation-aware VMEM budget: ~75% of physical, capped.
    v5e/v6e (128 MiB) -> 96 MiB, v7x (64 MiB) -> 48 MiB, unknown -> 48 MiB."""
    try:
        info = pltpu.get_tpu_info()
        cap = int(getattr(info, "vmem_capacity_bytes", 128 * 1024 * 1024))
    except Exception:
        cap = 64 * 1024 * 1024
    return min((cap * 3) // 4, 100 * 1024 * 1024)


_VMEM_LIMIT = _vmem_limit_bytes()


# ---------------------------------------------------------------------------
# Tiled matmul kernel (fused QKV projection and output projection, f32)
# ---------------------------------------------------------------------------
def _matmul_kernel(a_ref, b_ref, o_ref, acc_ref):
    @pl.when(pl.program_id(2) == 0)
    def _():
        acc_ref[...] = jnp.zeros_like(acc_ref)

    acc_ref[...] += jnp.dot(a_ref[...], b_ref[...],
                            preferred_element_type=jnp.float32)

    @pl.when(pl.program_id(2) == pl.num_programs(2) - 1)
    def _():
        o_ref[...] = acc_ref[...].astype(o_ref.dtype)


def _pick_tile(dim, targets, min_tile=8):
    """Largest tile from `targets` that divides dim; full extent if dim is small/odd."""
    if dim <= targets[0]:
        return dim
    for t in targets:
        if t >= min_tile and dim % t == 0:
            return t
    return dim


def pallas_matmul(a, b):
    """a @ b with a Pallas tiled-matmul kernel.  a: (M, K), b: (K, N)."""
    M, K = a.shape
    K2, N = b.shape
    assert K == K2
    # sub-32-bit dtypes need >= 16 sublanes per tile
    min_m = 8 if a.dtype.itemsize >= 4 else 16
    tm = _pick_tile(M, (512, 256, 128, 64, 32, 16, 8), min_tile=min_m)
    tn = _pick_tile(N, (512, 256, 128))
    tk = _pick_tile(K, (1024, 512, 256, 128))
    grid = (M // tm, N // tn, K // tk)
    return pl.pallas_call(
        _matmul_kernel,
        out_shape=jax.ShapeDtypeStruct((M, N), a.dtype),
        grid_spec=pltpu.PrefetchScalarGridSpec(
            num_scalar_prefetch=0,
            grid=grid,
            in_specs=[
                pl.BlockSpec((tm, tk), lambda i, j, k: (i, k)),
                pl.BlockSpec((tk, tn), lambda i, j, k: (k, j)),
            ],
            out_specs=pl.BlockSpec((tm, tn), lambda i, j, k: (i, j)),
            scratch_shapes=[pltpu.VMEM((tm, tn), jnp.float32)],
        ),
        compiler_params=pltpu.CompilerParams(
            dimension_semantics=("parallel", "parallel", "arbitrary"),
            vmem_limit_bytes=_VMEM_LIMIT),
    )(a, b)


# ---------------------------------------------------------------------------
# RoPE + bf16-cast kernel: one pass over the fused (B, S, 3D) QKV buffer.
#   column blocks 0 .. 2H-1   (Q and K head blocks)  -> RoPE + cast to bf16
#   column blocks 2H .. 3H-1  (V head blocks)        -> cast to bf16
# ---------------------------------------------------------------------------
def _rope_cast_kernel(x_ref, cos_ref, sin_ref, o_ref, *,
                      heads_per_block, rope_blocks, head_dim):
    hb = pl.program_id(2)

    @pl.when(hb < rope_blocks)
    def _():
        c = cos_ref[...]
        s = sin_ref[...]
        for j in range(heads_per_block):           # static unrolled loop over heads
            lo = j * head_dim
            hi = lo + head_dim
            x = x_ref[:, lo:hi]
            x1 = x[:, : head_dim // 2]
            x2 = x[:, head_dim // 2:]
            rot = jnp.concatenate([-x2, x1], axis=-1)
            o_ref[:, lo:hi] = (x * c + rot * s).astype(o_ref.dtype)

    @pl.when(hb >= rope_blocks)
    def _():
        o_ref[...] = x_ref[...].astype(o_ref.dtype)


def apply_rope_and_cast(qkv, cos, sin, *, num_heads, head_dim, row_block):
    """qkv: (B, S, 3D) f32 -> (B, S, 3D) bf16 with RoPE applied to the Q/K head columns."""
    B, S, three_d = qkv.shape
    H = num_heads
    Dh = head_dim
    # heads processed per grid step (keep lane width <= 512, must divide H so a block
    # never straddles the Q/K/V boundary)
    hpb = 1
    for cand in range(min(H, max(1, 512 // Dh)), 0, -1):
        if H % cand == 0:
            hpb = cand
            break
    n_hblocks = (3 * H) // hpb
    rope_blocks = (2 * H) // hpb
    tr = row_block
    grid = (B, S // tr, n_hblocks)
    kernel = functools.partial(_rope_cast_kernel, heads_per_block=hpb,
                               rope_blocks=rope_blocks, head_dim=Dh)
    return pl.pallas_call(
        kernel,
        out_shape=jax.ShapeDtypeStruct((B, S, three_d), jnp.bfloat16),
        grid_spec=pltpu.PrefetchScalarGridSpec(
            num_scalar_prefetch=0,
            grid=grid,
            in_specs=[
                pl.BlockSpec((None, tr, hpb * Dh), lambda b, si, hb: (b, si, hb)),
                pl.BlockSpec((tr, Dh), lambda b, si, hb: (si, 0)),
                pl.BlockSpec((tr, Dh), lambda b, si, hb: (si, 0)),
            ],
            out_specs=pl.BlockSpec((None, tr, hpb * Dh), lambda b, si, hb: (b, si, hb)),
        ),
        compiler_params=pltpu.CompilerParams(
            dimension_semantics=("parallel", "parallel", "parallel"),
            vmem_limit_bytes=_VMEM_LIMIT),
    )(qkv, cos, sin)


# ---------------------------------------------------------------------------
# Sliding-window flash attention, window-restricted KV grid, bf16 MXU operands
# ---------------------------------------------------------------------------
def _swa_flash_kernel(q_ref, k_ref, v_ref, o_ref, m_sc, l_sc, acc_sc, *,
                      seq_block, n_win_blocks, window_size, scale):
    qi = pl.program_id(2)
    ki = pl.program_id(3)

    @pl.when(ki == 0)
    def _():
        m_sc[...] = jnp.full_like(m_sc, _INIT_M)
        l_sc[...] = jnp.zeros_like(l_sc)
        acc_sc[...] = jnp.zeros_like(acc_sc)

    # Intended KV block for this (qi, ki); the BlockSpec index_map clamps it to >= 0,
    # here we skip the (duplicate) clamped steps and any block fully outside the window.
    kv_blk = qi - (n_win_blocks - 1) + ki
    q_start = qi * seq_block
    k_start = kv_blk * seq_block
    in_range = kv_blk >= 0
    in_window = (q_start - (k_start + seq_block - 1)) < window_size

    @pl.when(jnp.logical_and(in_range, in_window))
    def _():
        q = q_ref[...]                                    # (T, Dh) bf16
        k = k_ref[...]                                    # (T, Dh) bf16
        v = v_ref[...]                                    # (T, Dh) bf16
        s = lax.dot_general(q, k, (((1,), (1,)), ((), ())),
                            preferred_element_type=jnp.float32) * scale   # (T, T) f32

        def online_update(s_blk):
            m_prev = m_sc[...]
            m_new = jnp.maximum(m_prev, jnp.max(s_blk, axis=-1, keepdims=True))
            p = jnp.exp(s_blk - m_new)        # masked entries underflow to exactly 0
            alpha = jnp.exp(m_prev - m_new)
            l_sc[...] = alpha * l_sc[...] + jnp.sum(p, axis=-1, keepdims=True)
            acc_sc[...] = alpha * acc_sc[...] + jnp.dot(
                p.astype(v.dtype), v, preferred_element_type=jnp.float32)
            m_sc[...] = m_new

        # Interior block: every (row, col) pair satisfies 0 <= row-col < window_size,
        # so the mask can be skipped entirely.
        delta = q_start - k_start
        interior = jnp.logical_and(delta >= seq_block,
                                   delta + seq_block <= window_size)

        @pl.when(interior)
        def _():
            online_update(s)

        @pl.when(jnp.logical_not(interior))
        def _():
            diff = (delta
                    + lax.broadcasted_iota(jnp.int32, s.shape, 0)
                    - lax.broadcasted_iota(jnp.int32, s.shape, 1))
            allowed = jnp.logical_and(diff >= 0, diff < window_size)
            online_update(jnp.where(allowed, s, _MASK_VAL))

    @pl.when(ki == pl.num_programs(3) - 1)
    def _():
        o_ref[...] = (acc_sc[...] *
                      pl.reciprocal(l_sc[...], approx=True)).astype(o_ref.dtype)


def _pick_seq_block(s, target):
    if s <= target:
        return s
    t = target
    while t >= 16:
        if s % t == 0:
            return t
        t //= 2
    return s


def swa_attention(qkv_b16, *, num_heads, head_dim, window_size, scale, seq_block=512):
    """qkv_b16: (B, S, 3*H*Dh) bf16 (RoPE already applied to Q/K head columns).
    Returns (B, S, H*Dh) f32 laid out exactly as the out-projection input."""
    B, S, three_d = qkv_b16.shape
    H = num_heads
    Dh = head_dim
    assert three_d == 3 * H * Dh

    T = _pick_seq_block(S, seq_block)
    nq = S // T
    # Only KV blocks that can intersect the window are visited.
    n_win = min(pl.cdiv(window_size, T) + 1, nq)
    grid = (B, H, nq, n_win)

    kernel = functools.partial(_swa_flash_kernel, seq_block=T, n_win_blocks=n_win,
                               window_size=window_size, scale=scale)

    def q_map(b, h, qi, ki):
        return (b, qi, h)

    def k_map(b, h, qi, ki):
        return (b, jnp.maximum(qi - (n_win - 1) + ki, 0), H + h)

    def v_map(b, h, qi, ki):
        return (b, jnp.maximum(qi - (n_win - 1) + ki, 0), 2 * H + h)

    def o_map(b, h, qi, ki):
        return (b, qi, h)

    return pl.pallas_call(
        kernel,
        out_shape=jax.ShapeDtypeStruct((B, S, H * Dh), jnp.float32),
        grid_spec=pltpu.PrefetchScalarGridSpec(
            num_scalar_prefetch=0,
            grid=grid,
            in_specs=[
                pl.BlockSpec((None, T, Dh), q_map),
                pl.BlockSpec((None, T, Dh), k_map),
                pl.BlockSpec((None, T, Dh), v_map),
            ],
            out_specs=pl.BlockSpec((None, T, Dh), o_map),
            scratch_shapes=[
                pltpu.VMEM((T, 1), jnp.float32),    # running max
                pltpu.VMEM((T, 1), jnp.float32),    # running denominator
                pltpu.VMEM((T, Dh), jnp.float32),   # running numerator
            ],
        ),
        compiler_params=pltpu.CompilerParams(
            dimension_semantics=("parallel", "parallel", "parallel", "arbitrary"),
            vmem_limit_bytes=_VMEM_LIMIT),
    )(qkv_b16, qkv_b16, qkv_b16)


# ---------------------------------------------------------------------------
# Full forward pass
# ---------------------------------------------------------------------------
def build_rotary(head_dim, seq_len):
    inv_freq = 1.0 / (10000.0 ** (jnp.arange(0, head_dim, 2, dtype=jnp.float32) / head_dim))
    t = jnp.arange(seq_len, dtype=jnp.float32)
    freqs = jnp.einsum('i,j->ij', t, inv_freq)
    emb = jnp.concatenate([freqs, freqs], axis=-1)
    return jnp.cos(emb), jnp.sin(emb)          # each (S, Dh)


def gqa_and_swa_forward(x, w_qkv, w_out, *, num_heads, window_size, seq_block=512):
    """Eval-mode forward of GqaAndSwa. w_qkv: (D, 3D) = [Wq^T | Wk^T | Wv^T], w_out: (D, D).

    The PyTorch module's GQA reshape chain
      view(B,S,KVH,kv_head_dim) -> permute -> view(B,KVH,S,G,Dh) -> permute -> view(B,H,S,Dh)
    is element-for-element identical to a plain per-head column split
    (kv*kv_head_dim + g*Dh == (kv*G + g)*Dh), so head h simply reads columns [h*Dh, (h+1)*Dh).
    """
    B, S, D = x.shape
    H = num_heads
    assert D % H == 0
    Dh = D // H
    assert Dh % 128 == 0, "head_dim must be a multiple of 128 for the lane-blocked layout"
    assert S % 8 == 0

    x2d = x.reshape(B * S, D)
    qkv = pallas_matmul(x2d, w_qkv).reshape(B, S, 3 * D)          # (B, S, 3D) f32

    cos, sin = build_rotary(Dh, S)
    row_block = _pick_seq_block(S, 512)
    qkv_b16 = apply_rope_and_cast(qkv, cos, sin, num_heads=H, head_dim=Dh,
                                  row_block=row_block)            # (B, S, 3D) bf16

    scale = 1.0 / math.sqrt(Dh)
    o = swa_attention(qkv_b16, num_heads=H, head_dim=Dh,
                      window_size=window_size, scale=scale,
                      seq_block=seq_block)                        # (B, S, D) f32

    out = pallas_matmul(o.reshape(B * S, D), w_out)
    return out.reshape(B, S, D)


# ---------------------------------------------------------------------------
# Pure-JAX reference mirroring the PyTorch module (eval mode, mask=None)
# ---------------------------------------------------------------------------
def _reference_forward(x, w_q, w_k, w_v, w_o, *, num_heads, num_kv_heads, window_size):
    B, S, D = x.shape
    H = num_heads
    Dh = D // H
    kv_dh = D // num_kv_heads
    G = H // num_kv_heads
    hp = jax.lax.Precision.HIGHEST

    q = jnp.matmul(x, w_q, precision=hp).reshape(B, S, H, Dh).transpose(0, 2, 1, 3)
    k = jnp.matmul(x, w_k, precision=hp).reshape(B, S, num_kv_heads, kv_dh).transpose(0, 2, 1, 3)
    v = jnp.matmul(x, w_v, precision=hp).reshape(B, S, num_kv_heads, kv_dh).transpose(0, 2, 1, 3)
    k = k.reshape(B, num_kv_heads, S, G, Dh).transpose(0, 1, 3, 2, 4).reshape(B, H, S, Dh)
    v = v.reshape(B, num_kv_heads, S, G, Dh).transpose(0, 1, 3, 2, 4).reshape(B, H, S, Dh)

    cos, sin = build_rotary(Dh, S)
    cos = cos[None, None]
    sin = sin[None, None]

    def rotate_half(t):
        t1, t2 = jnp.split(t, 2, axis=-1)
        return jnp.concatenate([-t2, t1], axis=-1)

    q = q * cos + rotate_half(q) * sin
    k = k * cos + rotate_half(k) * sin

    scores = jnp.einsum('bhqd,bhkd->bhqk', q, k, precision=hp) / math.sqrt(Dh)
    i = jnp.arange(S)[:, None]
    j = jnp.arange(S)[None, :]
    diff = i - j
    smask = jnp.where((diff < 0) | (diff >= window_size), -jnp.inf, 0.0)
    scores = scores + smask[None, None]
    attn = jax.nn.softmax(scores, axis=-1)
    out = jnp.einsum('bhqk,bhkd->bhqd', attn, v, precision=hp)
    out = out.transpose(0, 2, 1, 3).reshape(B, S, D)
    return jnp.matmul(out, w_o, precision=hp)


if __name__ == "__main__":
    key = jax.random.PRNGKey(0)
    # Dh = d_model / num_heads = 128 (lane-aligned head blocks); S chosen so the
    # attention uses several 128-row blocks and exercises clamped / boundary /
    # interior / pruned KV blocks with window_size = 384.
    batch, seq, d_model = 2, 640, 512
    num_heads, num_kv_heads, window_size = 4, 2, 384

    kx, kq, kk, kv, ko = jax.random.split(key, 5)
    x = jax.random.normal(kx, (batch, seq, d_model), dtype=jnp.float32)
    wscale = 1.0 / math.sqrt(d_model)
    w_q = jax.random.normal(kq, (d_model, d_model), dtype=jnp.float32) * wscale
    w_k = jax.random.normal(kk, (d_model, d_model), dtype=jnp.float32) * wscale
    w_v = jax.random.normal(kv, (d_model, d_model), dtype=jnp.float32) * wscale
    w_o = jax.random.normal(ko, (d_model, d_model), dtype=jnp.float32) * wscale
    w_qkv = jnp.concatenate([w_q, w_k, w_v], axis=-1)     # fused (D, 3D)

    out = gqa_and_swa_forward(x, w_qkv, w_o,
                              num_heads=num_heads, window_size=window_size)
    out = jax.block_until_ready(out)

    ref = _reference_forward(x, w_q, w_k, w_v, w_o,
                             num_heads=num_heads, num_kv_heads=num_kv_heads,
                             window_size=window_size)

    assert out.shape == (batch, seq, d_model)
    max_err = float(jnp.max(jnp.abs(out - ref)))
    rel_err = float(jnp.linalg.norm(out - ref) / jnp.linalg.norm(ref))
    # Tolerance accommodates bf16 MXU operands in the attention matmuls (f32 accumulation)
    # vs the f32 HIGHEST-precision reference; real bugs (wrong mask, missing RoPE/scale)
    # produce O(0.1-1) errors on these inputs.
    assert rel_err < 2e-2, f"relative error vs reference too large: {rel_err}"
    assert jnp.allclose(out, ref, atol=2.5e-2, rtol=2.5e-2), \
        f"mismatch vs reference: max_abs_err={max_err}, rel_err={rel_err}"
    print("KERNEL_OK")
</pallas_src>

<mosaic_0001>
module attributes {stable_mosaic.version = 11 : i64} {
  func.func @_matmul_kernel(%arg0: i32, %arg1: i32, %arg2: i32, %arg3: memref<256x512xf32, #tpu.memory_space<vmem>>, %arg4: memref<512x512xf32, #tpu.memory_space<vmem>>, %arg5: memref<256x512xf32, #tpu.memory_space<vmem>>, %arg6: memref<256x512xf32, #tpu.memory_space<vmem>>) attributes {dimension_semantics = [#tpu.dimension_semantics<parallel>, #tpu.dimension_semantics<parallel>, #tpu.dimension_semantics<arbitrary>], iteration_bounds = array<i64: 5, 3, 1>, scalar_prefetch = 0 : i64, scratch_operands = 1 : i64, tpu.core_type = #tpu.core_type<tc>, window_params = [{transform_indices = @transform_0, window_bounds = array<i64: 256, 512>}, {transform_indices = @transform_1, window_bounds = array<i64: 512, 512>}, {transform_indices = @transform_2, window_bounds = array<i64: 256, 512>}]} {
    %c0_i32 = arith.constant 0 : i32
    %0 = arith.cmpi eq, %arg2, %c0_i32 : i32
    %1 = arith.extui %0 : i1 to i32
    %c0_i32_0 = arith.constant 0 : i32
    %2 = arith.cmpi ne, %1, %c0_i32_0 : i32
    scf.if %2 {
      %cst_10 = arith.constant 0.000000e+00 : f32
      %12 = vector.broadcast %cst_10 : f32 to vector<256x512xf32>
      %c0_11 = arith.constant 0 : index
      %c0_12 = arith.constant 0 : index
      %13 = vector.load %arg6[%c0_11, %c0_12] : memref<256x512xf32, #tpu.memory_space<vmem>>, vector<256x512xf32>
      tpu.vector_store %arg6[%c0_11, %c0_12], %12 {strides = array<i32>} : memref<256x512xf32, #tpu.memory_space<vmem>>, vector<256x512xf32>,
    } else {
    }
    %c0 = arith.constant 0 : index
    %c0_1 = arith.constant 0 : index
    %3 = vector.load %arg6[%c0, %c0_1] : memref<256x512xf32, #tpu.memory_space<vmem>>, vector<256x512xf32>
    %c0_2 = arith.constant 0 : index
    %c0_3 = arith.constant 0 : index
    %4 = vector.load %arg3[%c0_2, %c0_3] : memref<256x512xf32, #tpu.memory_space<vmem>>, vector<256x512xf32>
    %c0_4 = arith.constant 0 : index
    %c0_5 = arith.constant 0 : index
    %5 = vector.load %arg4[%c0_4, %c0_5] : memref<512x512xf32, #tpu.memory_space<vmem>>, vector<512x512xf32>
    %cst = arith.constant dense<0.000000e+00> : vector<256x512xf32>
    %6 = tpu.matmul %4, %5, %cst {dimension_numbers = #tpu.dot_dimension_numbers<[1], [0], [0], [1], [0, 0, 1, 1], [], []>} : vector<256x512xf32>, vector<512x512xf32>, vector<256x512xf32> -> vector<256x512xf32>
    %7 = arith.addf %3, %6 : vector<256x512xf32>
    %c0_6 = arith.constant 0 : index
    %c0_7 = arith.constant 0 : index
    %8 = vector.load %arg6[%c0_6, %c0_7] : memref<256x512xf32, #tpu.memory_space<vmem>>, vector<256x512xf32>
    tpu.vector_store %arg6[%c0_6, %c0_7], %7 {strides = array<i32>} : memref<256x512xf32, #tpu.memory_space<vmem>>, vector<256x512xf32>,
    %c0_i32_8 = arith.constant 0 : i32
    %9 = arith.cmpi eq, %arg2, %c0_i32_8 : i32
    %10 = arith.extui %9 : i1 to i32
    %c0_i32_9 = arith.constant 0 : i32
    %11 = arith.cmpi ne, %10, %c0_i32_9 : i32
    scf.if %11 {
      %c0_10 = arith.constant 0 : index
      %c0_11 = arith.constant 0 : index
      %12 = vector.load %arg6[%c0_10, %c0_11] : memref<256x512xf32, #tpu.memory_space<vmem>>, vector<256x512xf32>
      %c0_12 = arith.constant 0 : index
      %c0_13 = arith.constant 0 : index
      %13 = vector.load %arg5[%c0_12, %c0_13] : memref<256x512xf32, #tpu.memory_space<vmem>>, vector<256x512xf32>
      tpu.vector_store %arg5[%c0_12, %c0_13], %12 {strides = array<i32>} : memref<256x512xf32, #tpu.memory_space<vmem>>, vector<256x512xf32>,
    } else {
    }
    return
  }
  func.func @transform_0(%arg0: i32, %arg1: i32, %arg2: i32) -> (i32, i32) {
    %c0_i32 = arith.constant 0 : i32
    return %arg0, %arg2 : i32, i32
  }
  func.func @transform_1(%arg0: i32, %arg1: i32, %arg2: i32) -> (i32, i32) {
    %c0_i32 = arith.constant 0 : i32
    return %arg2, %arg1 : i32, i32
  }
  func.func @transform_2(%arg0: i32, %arg1: i32, %arg2: i32) -> (i32, i32) {
    %c0_i32 = arith.constant 0 : i32
    return %arg0, %arg1 : i32, i32
  }
}

</mosaic_0001>

<bundles_post_ra>
// kernel: tpu_custom_call.1
= control target key start
LH: loop header
LB: loop body
LE: loop exit
PB: predicated region body
PF: predicated region fallthrough
CT: control target
= control target key end

     0   :  { %s4213_s0 = inlined_call_operand.hbm [shape: f32[1280,512], index: 0, kind: input, shape index: {}]   ;;  %s4214_s1 = inlined_call_operand.hbm [shape: f32[512,1536], index: 1, kind: input, shape index: {}]   ;;  %s4215_s2 = inlined_call_operand.hbm [shape: f32[1280,1536], index: 2, kind: output, shape index: {}]  }
   0x1   :  { %4229 = sst [smem:[#allocation18_spill]] %s4213_s0 }
   0x2   :  { %4230 = sst [smem:[#allocation19_spill]] %s4215_s2 }
   0x3   :  { %7 = vsyncpa [#allocation4], 0 }
   0x4   :  { %9 = vsyncpa [#allocation4 + $0x1], 0 }
   0x5   :  { %10 = vsyncpa [#allocation7], 0 }
   0x6   :  { %12 = vsyncpa [#allocation7 + $0x1], 0 }
   0x7   :  { %13 = vsyncpa [#allocation5], 0 }
   0x8   :  { %15 = vsyncpa [#allocation5 + $0x1], 0  ;;  %s3345_s9 = smov 0   ;;  %s3347_s10 = smov 0  }
   0x9   :  { %s3349_s11 = smov 0   ;;  %s3351_s12 = smov 0  }
   0xa   :  { %s3353_s13 = smov 0   ;;  %s3355_s14 = smov 0  }
   0xb   :  { %s3357_s15 = smov 0   ;;  %s3359_s16 = smov 0  }
   0xc   :  { %s3361_s17 = smov 0   ;;  %s3363_s18 = smov 0  }
   0xd   :  { %s3365_s19 = smov 0   ;;  %s3367_s20 = smov 0  }
   0xe   :  { %s3369_s21 = smov 0   ;;  %s3371_s22 = smov 0  }
   0xf LB: > { %4231 = sst [smem:[#allocation12_spill]] %s3303_s18  ;;  %s2562_s23 = sadd.s32 4294967295, %s3319_s22   ;;  %s3319_s22 = sphi %s3371_s22, %s21_s22   ;;  %s3315_s21 = sphi %s3369_s21, %s4265_s21   ;;  %s3311_s20 = sphi %s3367_s20, %s4276_s20   ;;  %s3307_s19 = sphi %s3365_s19, %s4263_s19   ;;  %s3303_s18 = sphi %s3363_s18, %s4275_s18   ;;  %s3299_s17 = sphi %s3361_s17, %s4274_s17   ;;  %s3295_s16 = sphi %s3359_s16, %s4273_s16   ;;  %s3291_s15 = sphi %s3357_s15, %s4272_s15   ;;  %s3287_s14 = sphi %s3355_s14, %s4271_s14   ;;  %s3283_s13 = sphi %s3353_s13, %s4270_s13   ;;  %s3279_s12 = sphi %s3351_s12, %s4269_s12   ;;  %s3275_s11 = sphi %s3349_s11, %s4268_s11   ;;  %s3271_s10 = sphi %s3347_s10, %s4267_s10   ;;  %s3267_s9 = sphi %s3345_s9, %s4266_s9  }
  0x10   : > { %4232 = sst [smem:[#allocation13_spill]] %s3315_s21  ;;  %s40_s24 = sadd.s32 1, %s3315_s21 }
  0x11   : > { %p56_p0 = scmp.ne.s32.totalorder %s3299_s17, %s3295_s16  ;;  %p4217_p1 = scmp.eq.s32.totalorder %s3319_s22, 0 }
  0x12   : > { %p62_p2 = scmp.ne.s32.totalorder %s3295_s16, %s3291_s15  ;;  %p3420_p3 = scmp.eq.s32.totalorder %s2562_s23, 0 }
  0x13   : > { %p3424_p4 = scmp.eq.s32.totalorder %s2562_s23, 14  ;;  %p58_p5 = por %p4217_p1, %p56_p0 }
  0x14   : > { %p3432_p6 = por %p3420_p3, %p62_p2  ;;  %p4216_p7 = scmp.lt.s32.totalorder %s3319_s22, 15 }
  0x15   : > { %s4234_s27 = scalar_select %p3424_p4, 1, 0 }
  0x16   : > { %s4235_s28 = scalar_select %p3432_p6, 1, 0 }
  0x17   : > { %s142_s29 = sand.u32 1, %s3299_s17   ;;  %s2585_s30 = sshll.u32 %s3315_s21, 14 }
  0x18   : > { %s2566_s3 = sshll.u32 %s142_s29, 10  ;;  %s4236_s0 = sld [smem:[#allocation18_spill]] }
  0x19   : > { %s146_s7 = scalar_lea.vmem [#allocation3], %s2566_s3  ;;  %p3446_p8 = pnand %p4216_p7, %p58_p5 }
  0x1a   : > { %s156_s8 = sshll.u32 %s146_s7, 4  ;;  %s3452_s23 = scalar_lea.sflag [#allocation4], %s142_s29  ;;  %s3450_s8 = int_to_ptr.vmem [resolvable:$true] %s156_s8 }
  0x1b   : > { %p3111_p10 = pneg %p3446_p8 }
  0x1e   : > { %s3442_s6 = scalar_lea.hbm %s4236_s0, %s2585_s30  ;;  %s3114_s5 = scalar_lea.hbm %s4236_s0, 81920 }
  0x1f   : > { %s3109_s4 = scalar_lea.hbm %s3442_s6, 16384  ;;  %p3115_p13 = scmp.lt.u32.totalorder %s3442_s6, %s4236_s0 }
  0x20   : > { %p3110_p9 = scmp.ne.s32.totalorder %s3442_s6, %s3109_s4  ;;  %p3116_p0 = scmp.lt.u32.totalorder %s3114_s5, %s3109_s4 }
  0x21   : > { %p3118_p5 = scmp.lt.u32.totalorder %s3109_s4, %s3442_s6 }
  0x22   : > { %p3112_p11 = pnand %p3111_p10, %p3110_p9  ;;  %p3117_p2 = por %p3116_p0, %p3115_p13 }
  0x24   : > { %p3113_p12 = pneg %p3112_p11  ;;  %p3119_p7 = por %p3118_p5, %p3117_p2 }
  0x26   : > { %p3120_p1 = pnand %p3119_p7, %p3113_p12 }
  0x28   : > { %3123 = shalt.err (!%p3120_p1)
}
  0x29   : > { %s3124_s29 = scalar_lea.vmem %s3450_s8, 16384  ;;  %s3321_s30 = smov [#allocation3]  }
  0x2a   : > { %p3125_p9 = scmp.ne.s32.totalorder %s3450_s8, %s3124_s29  ;;  %s3129_s3 = sshll.u32 %s3321_s30, 4  ;;  %s3130_s3 = int_to_ptr.vmem [resolvable:$false] %s3129_s3 }
  0x2b   : > { %s3131_s25 = scalar_lea.vmem %s3130_s3, 32768  ;;  %p3132_p4 = scmp.lt.s32.totalorder %s3450_s8, %s3130_s3 }
  0x2c   : > { %p3127_p11 = pnand %p3125_p9, %p3111_p10  ;;  %p3133_p13 = scmp.lt.s32.totalorder %s3131_s25, %s3124_s29 }
  0x2e   : > { %p3128_p6 = pneg %p3127_p11  ;;  %p3134_p0 = por %p3133_p13, %p3132_p4 }
  0x30   : > { %p3135_p2 = pnand %p3134_p0, %p3128_p6 }
  0x32   : > { %3138 = shalt.err (!%p3135_p2)
}
  0x33   : > { %s4219_s4 = smov 512   ;;  %s4220_s5 = smov 32  }
  0x34   : > { %2981 = dma.hbm_to_vmem [thread:$0]  (!%p3446_p8), %s3442_s6, 16384, %s3450_s8, %s3452_s23, %s4219_s4, %s4219_s4, %s4220_s5  }
  0x35   : > { %p2573_p1 = scmp.ge.s32.totalorder %s3319_s22, 1  ;;  %p188_p4 = scmp.lt.s32.totalorder %s3319_s22, 16 }
  0x36   : > { %s2563_s29 = sadd.s32 4294967294, %s3319_s22   ;;  %s36_s30 = sadd.s32 1, %s3311_s20 }
  0x37   : > { %p3485_p6 = pnand %p2573_p1, %p188_p4  ;;  %s77_s3 = sadd.s32 1, %s3287_s14 }
  0x38   : > { %p38_p7 = scmp.ge.s32.totalorder %s36_s30, 3  ;;  %p84_p10 = scmp.ne.s32.totalorder %s3287_s14, %s3283_s13 }
  0x39   : > { %p90_p12 = scmp.ne.s32.totalorder %s3283_s13, %s3279_s12  ;;  %s105_s15 = sadd.s32 1, %s3275_s11 }
  0x3a   : > { %s4278_s30 = smov (%p38_p7, %s36_s30), 0  ;;  %s4280_s24 = smov (!%p38_p7, %s40_s24), %s3315_s21 }
  0x3b   : > { %4239 = sst [smem:[#allocation14_spill]] %s4278_s30  ;;  %s73_s6 = ssub.s32 %s3311_s20, %s4278_s30 }
  0x3c   : > { %p4240_p8 = scmp.eq.s32.totalorder %s3319_s22, 0  ;;  %p42_p9 = scmp.ge.s32.totalorder %s4280_s24, 5 }
  0x3d   : > { %p75_p11 = scmp.eq.s32.totalorder %s73_s6, 0  ;;  %p3512_p13 = por %p90_p12, %p3420_p3 }
  0x3e   : > { %p3506_p5 = por %p84_p10, %p4240_p8  ;;  %p115_p0 = scmp.ne.s32.totalorder %s3275_s11, %s3271_s10 }
  0x3f   : > { %s4242_s12 = scalar_select %p3512_p13, 1, 0 }
  0x40   : > { %s4282_s24 = smov (%p42_p9, %s4280_s24), 0  ;;  %p4245_p2 = scmp.ne.s32.totalorder %s4234_s27, 0 }
  0x41   : > { %4243 = sst [smem:[#allocation15_spill]] %s4282_s24  ;;  %s44_s25 = ssub.s32 %s3315_s21, %s4282_s24 }
  0x42   : > { %s3521_s23 = scalar_select %p75_p11, %s3287_s14, %s77_s3  }
  0x43   : > { %p3527_p1 = por %p4245_p2, %p115_p0  ;;  %p47_p4 = scmp.eq.s32.totalorder %s44_s25, 0 }
  0x44   : > { %4244 = sst [smem:[#allocation16_spill]] %s3521_s23  ;;  %s102_s26 = sor.u32 %s73_s6, %s44_s25 }
  0x45   : > { %s4246_s4 = scalar_select %p3527_p1, 1, 0 }
  0x46   : > { %p103_p3 = scmp.eq.s32.totalorder %s102_s26, 0  ;;  %p121_p7 = scmp.ne.s32.totalorder %s3271_s10, %s3267_s9 }
  0x47   : > { %4247 = sst [smem:[#allocation17_spill]] %s4246_s4  ;;  %s4248_s5 = sadd.s32 1, %s3299_s17 }
  0x48   : > { %s3536_s0 = scalar_select %p47_p4, %s3299_s17, %s4248_s5  }
  0x49   : > { %s3539_s30 = scalar_select %p103_p3, %s3275_s11, %s105_s15  }
  0x4a   : > { %p122_p10 = scmp.eq.s32.totalorder %s2563_s29, 14  ;;  %s166_s3 = sand.u32 1, %s3287_s14  }
  0x4b   : > { %s2570_s23 = sshll.u32 %s166_s3, 11  ;;  %s2586_s24 = sshll.u32 %s3311_s20, 9 }
  0x4c   : > { %p3542_p12 = por %p122_p10, %p121_p7  ;;  %s170_s21 = scalar_lea.vmem [#allocation6], %s2570_s23 }
  0x4d   : > { %s180_s2 = sshll.u32 %s170_s21, 4  ;;  %s3550_s6 = scalar_lea.hbm %s4214_s1, %s2586_s24  ;;  %s3552_s2 = int_to_ptr.vmem [resolvable:$true] %s180_s2 }
  0x4e   : > { %s4249_s27 = scalar_select %p3542_p12, 1, 0 }
  0x4f   : > { %p4250_p8 = scmp.lt.s32.totalorder %s3319_s22, 15  ;;  %s3562_s21 = scalar_lea.sflag [#allocation7], %s166_s3 }
  0x50   : > { %s3139_s29 = scalar_lea.hbm %s3550_s6, 32768  ;;  %s3144_s4 = scalar_lea.hbm %s4214_s1, 98304 }
  0x51   : > { %p3558_p9 = pnand %p4250_p8, %p3506_p5  ;;  %p3140_p11 = scmp.ne.s32.totalorder %s3550_s6, %s3139_s29 }
  0x52   : > { %p3145_p5 = scmp.lt.u32.totalorder %s3550_s6, %s4214_s1  ;;  %p3146_p3 = scmp.lt.u32.totalorder %s3144_s4, %s3139_s29 }
  0x53   : > { %p3141_p0 = pneg %p3558_p9  ;;  %p3148_p10 = scmp.lt.u32.totalorder %s3139_s29, %s3550_s6 }
  0x54   : > { %p3147_p7 = por %p3146_p3, %p3145_p5 }
  0x55   : > { %p3142_p2 = pnand %p3141_p0, %p3140_p11 }
  0x56   : > { %p3149_p8 = por %p3148_p10, %p3147_p7 }
  0x57   : > { %p3143_p4 = pneg %p3142_p2 }
  0x59   : > { %p3150_p12 = pnand %p3149_p8, %p3143_p4 }
  0x5b   : > { %3153 = shalt.err (!%p3150_p12)
}
  0x5c   : > { %s3154_s23 = scalar_lea.vmem %s3552_s2, 32768  ;;  %s3324_s25 = smov [#allocation6]  }
  0x5d   : > { %p3155_p11 = scmp.ne.s32.totalorder %s3552_s2, %s3154_s23  ;;  %s3159_s26 = sshll.u32 %s3324_s25, 4  ;;  %s3160_s26 = int_to_ptr.vmem [resolvable:$false] %s3159_s26 }
  0x5e   : > { %s3161_s3 = scalar_lea.vmem %s3160_s26, 65536  ;;  %p3162_p13 = scmp.lt.s32.totalorder %s3552_s2, %s3160_s26 }
  0x5f   : > { %p3157_p2 = pnand %p3155_p11, %p3141_p0  ;;  %p3163_p5 = scmp.lt.s32.totalorder %s3161_s3, %s3154_s23 }
  0x61   : > { %p3158_p1 = pneg %p3157_p2  ;;  %p3164_p3 = por %p3163_p5, %p3162_p13 }
  0x63   : > { %p3165_p7 = pnand %p3164_p3, %p3158_p1 }
  0x65   : > { %3168 = shalt.err (!%p3165_p7)
}
  0x66   : > { %s3325_s29 = smov 1536   ;;  %s4252_s18 = smov 32  }
  0x67   : > { %s4253_s24 = smov 512   ;;  %192 = sbr.rel (%p3485_p6) target bundleno = 665 (0x299), region = 28 }
  0x68   : > { %2984 = dma.hbm_to_vmem [thread:$0]  (!%p3558_p9), %s3550_s6, 32768, %s3552_s2, %s3562_s21, %s3325_s29, %s4253_s24, %s4252_s18  }
  0x69   : > { %s194_s4 = sand.u32 (!%p3485_p6), 1, %s3295_s16   ;;  %p4254_p13 = scmp.ne.s32.totalorder (!%p3485_p6), %s4235_s28, 0 }
  0x6a   : > { %s2574_s15 = sshll.u32 (!%p3485_p6), %s194_s4, 10  ;;  %s195_s8 = scalar_lea.sflag (!%p3485_p6), [#allocation4], %s194_s4 }
  0x6b   : > { %s3595_s23 = scalar_lea.vmem (!%p3485_p6), [#allocation3], %s2574_s15 }
  0x6e   : > { %3254 = dma.done.wait (%p4254_p13), %s195_s8, 16384  }
  0x6f   : > { %3256 = vsyncadd (%p4254_p13), %s195_s8, 4294950912  ;;  %s203_s5 = sand.u32 1, %s3283_s13   ;;  %p4255_p6 = scmp.ne.s32.totalorder %s4242_s12, 0 }
  0x70   : > { %s2575_s25 = sshll.u32 %s203_s5, 11  ;;  %s204_s2 = scalar_lea.sflag [#allocation7], %s203_s5 }
  0x71   : > { %s3602_s6 = scalar_lea.vmem [#allocation6], %s2575_s25 }
  0x72   : > { %3258 = dma.done.wait (%p4255_p6), %s204_s2, 32768  }
  0x73   : > { %3260 = vsyncadd (%p4255_p6), %s204_s2, 4294934528  ;;  %v628_v0 = vld [vmem:[%s3602_s6 + $0x8] sm:$0xff]  ;;  %v630_v2 = vld [vmem:[%s3602_s6 + $0x18] sm:$0xff]  ;;  %s230_s28 = sand.u32 1, %s3271_s10   ;;  %s4256_s21 = sld [smem:[#allocation12_spill]] }
  0x74   : > { %v632_v1 = vld [vmem:[%s3602_s6 + $0x28] sm:$0xff]  ;;  %v634_v4 = vld [vmem:[%s3602_s6 + $0x38] sm:$0xff]  ;;  %v627_v5 = vld [vmem:[%s3602_s6] sm:$0xff]  ;;  %s2576_s7 = sshll.u32 %s230_s28, 10  ;;  %s2971_s26 = smul.u32 384, %s3307_s19 }
  0x75   : > { %v2587_v3 = vpack.c.bf16 %v632_v1, %v628_v0  ;;  %v631_v6 = vld [vmem:[%s3602_s6 + $0x20] sm:$0xff]  ;;  %v2715_v7 = vpack.c.bf16 %v634_v4, %v630_v2  ;;  %v629_v9 = vld [vmem:[%s3602_s6 + $0x10] sm:$0xff]  ;;  %v636_v11 = vld [vmem:[%s3602_s6 + $0x48] sm:$0xff]  ;;  %s3995_s12 = scalar_lea.vmem [#allocation8], %s2576_s7  ;;  %s4257_s24 = sld [smem:[#allocation17_spill]] }
  0x76   : > { %v2589_v8 = vpack.c.bf16 %v631_v6, %v627_v5  ;;  %v633_v10 = vld [vmem:[%s3602_s6 + $0x30] sm:$0xff]  ;;  %v640_v13 = vld [vmem:[%s3602_s6 + $0x68] sm:$0xff]  ;;  %v638_v14 = vld [vmem:[%s3602_s6 + $0x58] sm:$0xff]  ;;  %s2443_s18 = sshll.u32 %s3995_s12, 4  ;;  %s4258_s8 = sld [smem:[#allocation19_spill]]  ;;  %s4129_s18 = int_to_ptr.vmem [resolvable:$true] %s2443_s18 }
  0x77   : > { %2588 = vmatprep.subr.bf16.mxu0 %v2587_v3  ;;  %v2717_v12 = vpack.c.bf16 %v633_v10, %v629_v9  ;;  %v642_v15 = vld [vmem:[%s3602_s6 + $0x78] sm:$0xff]  ;;  %2716 = vmatprep.subr.bf16.mxu1 %v2715_v7  ;;  %v2591_v16 = vpack.c.bf16 %v640_v13, %v636_v11  ;;  %v635_v18 = vld [vmem:[%s3602_s6 + $0x40] sm:$0xff]  ;;  %v637_v20 = vld [vmem:[%s3602_s6 + $0x50] sm:$0xff]  ;;  %s4137_s5 = scalar_lea.sflag [#allocation5], %s230_s28  ;;  %s3169_s25 = scalar_lea.vmem %s4129_s18, 16384 }
  0x78   : > { %2590 = vmatpush1.bf16.msra.mxu0 %v2589_v8  ;;  %v2719_v17 = vpack.c.bf16 %v642_v15, %v638_v14  ;;  %v639_v19 = vld [vmem:[%s3602_s6 + $0x60] sm:$0xff]  ;;  %v641_v22 = vld [vmem:[%s3602_s6 + $0x70] sm:$0xff]  ;;  %v644_v23 = vld [vmem:[%s3602_s6 + $0x88] sm:$0xff]  ;;  %p3170_p1 = scmp.ne.s32.totalorder %s4129_s18, %s3169_s25  ;;  %s3326_s2 = smov [#allocation8]  }
  0x79   : > { %2718 = vmatpush1.bf16.msra.mxu1 %v2717_v12  ;;  %v2593_v21 = vpack.c.bf16 %v639_v19, %v635_v18  ;;  %v648_v24 = vld [vmem:[%s3602_s6 + $0xa8] sm:$0xff]  ;;  %2592 = vmatprep.subr.bf16.mxu0 %v2591_v16  ;;  %v2721_v25 = vpack.c.bf16 %v641_v22, %v637_v20  ;;  %v646_v27 = vld [vmem:[%s3602_s6 + $0x98] sm:$0xff]  ;;  %v643_v29 = vld [vmem:[%s3602_s6 + $0x80] sm:$0xff]  ;;  %s2579_s3 = sshll.u32 %s4256_s21, 2 }
  0x7a   : > { %2720 = vmatprep.subr.bf16.mxu1 %v2719_v17  ;;  %v2595_v26 = vpack.c.bf16 %v648_v24, %v644_v23  ;;  %v650_v28 = vld [vmem:[%s3602_s6 + $0xb8] sm:$0xff]  ;;  %v647_v31 = vld [vmem:[%s3602_s6 + $0xa0] sm:$0xff]  ;;  %v645_v32 = vld [vmem:[%s3602_s6 + $0x90] sm:$0xff]  ;;  %s2440_s29 = sadd.s32 %s2971_s26, %s2579_s3 }
  0x7b   : > { %v2723_v30 = vpack.c.bf16 %v650_v28, %v646_v27  ;;  %v649_v33 = vld [vmem:[%s3602_s6 + $0xb0] sm:$0xff]  ;;  %v2597_v34 = vpack.c.bf16 %v647_v31, %v643_v29  ;;  %v652_v35 = vld [vmem:[%s3602_s6 + $0xc8] sm:$0xff]  ;;  %v654_v37 = vld [vmem:[%s3602_s6 + $0xd8] sm:$0xff]  ;;  %s2581_s19 = sshll.u32 %s2440_s29, 7  ;;  %p4259_p12 = scmp.ne.s32.totalorder %s4257_s24, 0 }
  0x7c   : > { %2594 = vmatpush1.bf16.msra.mxu0 %v2593_v21  ;;  %v656_v36 = vld [vmem:[%s3602_s6 + $0xe8] sm:$0xff]  ;;  %v2725_v38 = vpack.c.bf16 %v649_v33, %v645_v32  ;;  %v658_v40 = vld [vmem:[%s3602_s6 + $0xf8] sm:$0xff]  ;;  %v651_v41 = vld [vmem:[%s3602_s6 + $0xc0] sm:$0xff] }
  0x7d   : > { %2722 = vmatpush1.bf16.msra.mxu1 %v2721_v25  ;;  %2596 = vmatprep.subr.bf16.mxu0 %v2595_v26  ;;  %v2599_v39 = vpack.c.bf16 %v656_v36, %v652_v35  ;;  %v655_v42 = vld [vmem:[%s3602_s6 + $0xe0] sm:$0xff]  ;;  %v2727_v43 = vpack.c.bf16 %v658_v40, %v654_v37  ;;  %v653_v44 = vld [vmem:[%s3602_s6 + $0xd0] sm:$0xff]  ;;  %v660_v46 = vld [vmem:[%s3602_s6 + $0x108] sm:$0xff]  ;;  %p3171_p9 = pnand %p3170_p1, %p4259_p12 }
  0x7e   : > { %2724 = vmatprep.subr.bf16.mxu1 %v2723_v30  ;;  %v657_v45 = vld [vmem:[%s3602_s6 + $0xf0] sm:$0xff]  ;;  %v664_v47 = vld [vmem:[%s3602_s6 + $0x128] sm:$0xff]  ;;  %v662_v48 = vld [vmem:[%s3602_s6 + $0x118] sm:$0xff]  ;;  %v2601_v50 = vpack.c.bf16 %v655_v42, %v651_v41 }
  0x7f   : > { %v666_v49 = vld [vmem:[%s3602_s6 + $0x138] sm:$0xff]  ;;  %v2729_v51 = vpack.c.bf16 %v657_v45, %v653_v44  ;;  %v2603_v52 = vpack.c.bf16 %v664_v47, %v660_v46  ;;  %v659_v53 = vld [vmem:[%s3602_s6 + $0x100] sm:$0xff]  ;;  %v661_v55 = vld [vmem:[%s3602_s6 + $0x110] sm:$0xff]  ;;  %p3172_p0 = pneg %p3171_p9 }
  0x80   : > { %2598 = vmatpush1.bf16.msra.mxu0 %v2597_v34  ;;  %v663_v54 = vld [vmem:[%s3602_s6 + $0x120] sm:$0xff]  ;;  %v2731_v56 = vpack.c.bf16 %v666_v49, %v662_v48  ;;  %v665_v57 = vld [vmem:[%s3602_s6 + $0x130] sm:$0xff]  ;;  %v668_v58 = vld [vmem:[%s3602_s6 + $0x148] sm:$0xff] }
  0x81   : > { %2726 = vmatpush1.bf16.msra.mxu1 %v2725_v38  ;;  %2600 = vmatprep.subr.bf16.mxu0 %v2599_v39  ;;  %v672_v59 = vld [vmem:[%s3602_s6 + $0x168] sm:$0xff]  ;;  %v670_v60 = vld [vmem:[%s3602_s6 + $0x158] sm:$0xff]  ;;  %v2605_v62 = vpack.c.bf16 %v663_v54, %v659_v53  ;;  %v2733_v63 = vpack.c.bf16 %v665_v57, %v661_v55  ;;  %v667_v1 = vld [vmem:[%s3602_s6 + $0x140] sm:$0xff] }
  0x82   : > { %2728 = vmatprep.subr.bf16.mxu1 %v2727_v43  ;;  %v674_v61 = vld [vmem:[%s3602_s6 + $0x178] sm:$0xff]  ;;  %v2607_v0 = vpack.c.bf16 %v672_v59, %v668_v58  ;;  %v671_v2 = vld [vmem:[%s3602_s6 + $0x160] sm:$0xff]  ;;  %v669_v3 = vld [vmem:[%s3602_s6 + $0x150] sm:$0xff] }
  0x83   : > { %v2735_v4 = vpack.c.bf16 %v674_v61, %v670_v60  ;;  %v673_v5 = vld [vmem:[%s3602_s6 + $0x170] sm:$0xff]  ;;  %v676_v6 = vld [vmem:[%s3602_s6 + $0x188] sm:$0xff]  ;;  %v678_v8 = vld [vmem:[%s3602_s6 + $0x198] sm:$0xff]  ;;  %v2609_v10 = vpack.c.bf16 %v671_v2, %v667_v1 }
  0x84   : > { %2602 = vmatpush1.bf16.msra.mxu0 %v2601_v50  ;;  %v680_v7 = vld [vmem:[%s3602_s6 + $0x1a8] sm:$0xff]  ;;  %v682_v9 = vld [vmem:[%s3602_s6 + $0x1b8] sm:$0xff]  ;;  %v2737_v11 = vpack.c.bf16 %v673_v5, %v669_v3  ;;  %v675_v13 = vld [vmem:[%s3602_s6 + $0x180] sm:$0xff] }
  0x85   : > { %2730 = vmatpush1.bf16.msra.mxu1 %v2729_v51  ;;  %2604 = vmatprep.subr.bf16.mxu0 %v2603_v52  ;;  %v2611_v12 = vpack.c.bf16 %v680_v7, %v676_v6  ;;  %v679_v14 = vld [vmem:[%s3602_s6 + $0x1a0] sm:$0xff]  ;;  %v677_v15 = vld [vmem:[%s3602_s6 + $0x190] sm:$0xff]  ;;  %v2739_v16 = vpack.c.bf16 %v682_v9, %v678_v8  ;;  %v684_v18 = vld [vmem:[%s3602_s6 + $0x1c8] sm:$0xff] }
  0x86   : > { %2732 = vmatprep.subr.bf16.mxu1 %v2731_v56  ;;  %v681_v17 = vld [vmem:[%s3602_s6 + $0x1b0] sm:$0xff]  ;;  %v688_v19 = vld [vmem:[%s3602_s6 + $0x1e8] sm:$0xff]  ;;  %v686_v20 = vld [vmem:[%s3602_s6 + $0x1d8] sm:$0xff]  ;;  %v2613_v22 = vpack.c.bf16 %v679_v14, %v675_v13 }
  0x87   : > { %v690_v21 = vld [vmem:[%s3602_s6 + $0x1f8] sm:$0xff]  ;;  %v2741_v23 = vpack.c.bf16 %v681_v17, %v677_v15  ;;  %v2615_v24 = vpack.c.bf16 %v688_v19, %v684_v18  ;;  %v683_v25 = vld [vmem:[%s3602_s6 + $0x1c0] sm:$0xff]  ;;  %v685_v27 = vld [vmem:[%s3602_s6 + $0x1d0] sm:$0xff] }
  0x88   : > { %2606 = vmatpush1.bf16.msra.mxu0 %v2605_v62  ;;  %v687_v26 = vld [vmem:[%s3602_s6 + $0x1e0] sm:$0xff]  ;;  %v2743_v28 = vpack.c.bf16 %v690_v21, %v686_v20  ;;  %v689_v29 = vld [vmem:[%s3602_s6 + $0x1f0] sm:$0xff]  ;;  %v692_v30 = vld [vmem:[%s3602_s6 + $0x208] sm:$0xff] }
  0x89   : > { %2734 = vmatpush1.bf16.msra.mxu1 %v2733_v63  ;;  %2608 = vmatprep.subr.bf16.mxu0 %v2607_v0  ;;  %v696_v31 = vld [vmem:[%s3602_s6 + $0x228] sm:$0xff]  ;;  %v694_v32 = vld [vmem:[%s3602_s6 + $0x218] sm:$0xff]  ;;  %v2617_v34 = vpack.c.bf16 %v687_v26, %v683_v25  ;;  %v2745_v35 = vpack.c.bf16 %v689_v29, %v685_v27  ;;  %v691_v37 = vld [vmem:[%s3602_s6 + $0x200] sm:$0xff] }
  0x8a   : > { %2736 = vmatprep.subr.bf16.mxu1 %v2735_v4  ;;  %v698_v33 = vld [vmem:[%s3602_s6 + $0x238] sm:$0xff]  ;;  %v2619_v36 = vpack.c.bf16 %v696_v31, %v692_v30  ;;  %v695_v38 = vld [vmem:[%s3602_s6 + $0x220] sm:$0xff]  ;;  %v693_v39 = vld [vmem:[%s3602_s6 + $0x210] sm:$0xff] }
  0x8b   : > { %v2747_v40 = vpack.c.bf16 %v698_v33, %v694_v32  ;;  %v697_v41 = vld [vmem:[%s3602_s6 + $0x230] sm:$0xff]  ;;  %v700_v42 = vld [vmem:[%s3602_s6 + $0x248] sm:$0xff]  ;;  %v702_v44 = vld [vmem:[%s3602_s6 + $0x258] sm:$0xff]  ;;  %v2621_v46 = vpack.c.bf16 %v695_v38, %v691_v37 }
  0x8c   : > { %2610 = vmatpush1.bf16.msra.mxu0 %v2609_v10  ;;  %v704_v43 = vld [vmem:[%s3602_s6 + $0x268] sm:$0xff]  ;;  %v706_v45 = vld [vmem:[%s3602_s6 + $0x278] sm:$0xff]  ;;  %v2749_v47 = vpack.c.bf16 %v697_v41, %v693_v39  ;;  %v699_v49 = vld [vmem:[%s3602_s6 + $0x240] sm:$0xff] }
  0x8d   : > { %2738 = vmatpush1.bf16.msra.mxu1 %v2737_v11  ;;  %2612 = vmatprep.subr.bf16.mxu0 %v2611_v12  ;;  %v2623_v48 = vpack.c.bf16 %v704_v43, %v700_v42  ;;  %v703_v50 = vld [vmem:[%s3602_s6 + $0x260] sm:$0xff]  ;;  %v701_v51 = vld [vmem:[%s3602_s6 + $0x250] sm:$0xff]  ;;  %v2751_v52 = vpack.c.bf16 %v706_v45, %v702_v44  ;;  %v708_v54 = vld [vmem:[%s3602_s6 + $0x288] sm:$0xff] }
  0x8e   : > { %2740 = vmatprep.subr.bf16.mxu1 %v2739_v16  ;;  %v705_v53 = vld [vmem:[%s3602_s6 + $0x270] sm:$0xff]  ;;  %v712_v55 = vld [vmem:[%s3602_s6 + $0x2a8] sm:$0xff]  ;;  %v710_v56 = vld [vmem:[%s3602_s6 + $0x298] sm:$0xff]  ;;  %v2625_v58 = vpack.c.bf16 %v703_v50, %v699_v49 }
  0x8f   : > { %v714_v57 = vld [vmem:[%s3602_s6 + $0x2b8] sm:$0xff]  ;;  %v2753_v59 = vpack.c.bf16 %v705_v53, %v701_v51  ;;  %v2627_v60 = vpack.c.bf16 %v712_v55, %v708_v54  ;;  %v707_v61 = vld [vmem:[%s3602_s6 + $0x280] sm:$0xff]  ;;  %v709_v63 = vld [vmem:[%s3602_s6 + $0x290] sm:$0xff] }
  0x90   : > { %2614 = vmatpush1.bf16.msra.mxu0 %v2613_v22  ;;  %v711_v62 = vld [vmem:[%s3602_s6 + $0x2a0] sm:$0xff]  ;;  %v2755_v0 = vpack.c.bf16 %v714_v57, %v710_v56  ;;  %v713_v1 = vld [vmem:[%s3602_s6 + $0x2b0] sm:$0xff]  ;;  %v716_v2 = vld [vmem:[%s3602_s6 + $0x2c8] sm:$0xff] }
  0x91   : > { %2742 = vmatpush1.bf16.msra.mxu1 %v2741_v23  ;;  %2616 = vmatprep.subr.bf16.mxu0 %v2615_v24  ;;  %v720_v3 = vld [vmem:[%s3602_s6 + $0x2e8] sm:$0xff]  ;;  %v718_v4 = vld [vmem:[%s3602_s6 + $0x2d8] sm:$0xff]  ;;  %v2629_v6 = vpack.c.bf16 %v711_v62, %v707_v61  ;;  %v715_v7 = vld [vmem:[%s3602_s6 + $0x2c0] sm:$0xff]  ;;  %v2757_v8 = vpack.c.bf16 %v713_v1, %v709_v63 }
  0x92   : > { %2744 = vmatprep.subr.bf16.mxu1 %v2743_v28  ;;  %v722_v5 = vld [vmem:[%s3602_s6 + $0x2f8] sm:$0xff]  ;;  %v2631_v9 = vpack.c.bf16 %v720_v3, %v716_v2  ;;  %v719_v10 = vld [vmem:[%s3602_s6 + $0x2e0] sm:$0xff]  ;;  %v717_v11 = vld [vmem:[%s3602_s6 + $0x2d0] sm:$0xff] }
  0x93   : > { %v721_v12 = vld [vmem:[%s3602_s6 + $0x2f0] sm:$0xff]  ;;  %v2759_v13 = vpack.c.bf16 %v722_v5, %v718_v4  ;;  %v724_v14 = vld [vmem:[%s3602_s6 + $0x308] sm:$0xff]  ;;  %v726_v17 = vld [vmem:[%s3602_s6 + $0x318] sm:$0xff]  ;;  %v2633_v19 = vpack.c.bf16 %v719_v10, %v715_v7 }
  0x94   : > { %2618 = vmatpush1.bf16.msra.mxu0 %v2617_v34  ;;  %v728_v15 = vld [vmem:[%s3602_s6 + $0x328] sm:$0xff]  ;;  %v730_v18 = vld [vmem:[%s3602_s6 + $0x338] sm:$0xff]  ;;  %v2761_v20 = vpack.c.bf16 %v721_v12, %v717_v11  ;;  %v723_v22 = vld [vmem:[%s3602_s6 + $0x300] sm:$0xff] }
  0x95   : > { %2746 = vmatpush1.bf16.msra.mxu1 %v2745_v35  ;;  %2620 = vmatprep.subr.bf16.mxu0 %v2619_v36  ;;  %v500_v16 = vld [vmem:[%s3595_s23 + $0x8] sm:$0xff]  ;;  %v2635_v21 = vpack.c.bf16 %v728_v15, %v724_v14  ;;  %v727_v23 = vld [vmem:[%s3602_s6 + $0x320] sm:$0xff]  ;;  %v725_v24 = vld [vmem:[%s3602_s6 + $0x310] sm:$0xff]  ;;  %v2763_v25 = vpack.c.bf16 %v730_v18, %v726_v17 }
  0x96   : > { %2748 = vmatprep.subr.bf16.mxu1 %v2747_v40  ;;  %947 = vmatprep.mubr.f32.mxu0 %v500_v16  ;;  %v729_v26 = vld [vmem:[%s3602_s6 + $0x330] sm:$0xff]  ;;  %v732_v27 = vld [vmem:[%s3602_s6 + $0x348] sm:$0xff]  ;;  %v734_v29 = vld [vmem:[%s3602_s6 + $0x358] sm:$0xff]  ;;  %v2637_v31 = vpack.c.bf16 %v727_v23, %v723_v22 }
  0x97   : > { %1461 = vmatprep.mubr.f32.mxu1 %v500_v16  ;;  %v736_v28 = vld [vmem:[%s3602_s6 + $0x368] sm:$0xff]  ;;  %v738_v30 = vld [vmem:[%s3602_s6 + $0x378] sm:$0xff]  ;;  %v2765_v32 = vpack.c.bf16 %v729_v26, %v725_v24  ;;  %v731_v34 = vld [vmem:[%s3602_s6 + $0x340] sm:$0xff] }
  0x98   : > { %2622 = vmatpush1.bf16.msra.mxu0 %v2621_v46  ;;  %v2639_v33 = vpack.c.bf16 %v736_v28, %v732_v27  ;;  %v735_v35 = vld [vmem:[%s3602_s6 + $0x360] sm:$0xff]  ;;  %v733_v36 = vld [vmem:[%s3602_s6 + $0x350] sm:$0xff]  ;;  %v2767_v37 = vpack.c.bf16 %v738_v30, %v734_v29  ;;  %v740_v39 = vld [vmem:[%s3602_s6 + $0x388] sm:$0xff] }
  0x99   : > { %2750 = vmatpush1.bf16.msra.mxu1 %v2749_v47  ;;  %2624 = vmatprep.subr.bf16.mxu0 %v2623_v48  ;;  %v737_v38 = vld [vmem:[%s3602_s6 + $0x370] sm:$0xff]  ;;  %v744_v40 = vld [vmem:[%s3602_s6 + $0x3a8] sm:$0xff]  ;;  %v742_v41 = vld [vmem:[%s3602_s6 + $0x398] sm:$0xff]  ;;  %v2641_v43 = vpack.c.bf16 %v735_v35, %v731_v34 }
  0x9a   : > { %2752 = vmatprep.subr.bf16.mxu1 %v2751_v52  ;;  %v746_v42 = vld [vmem:[%s3602_s6 + $0x3b8] sm:$0xff]  ;;  %v2769_v44 = vpack.c.bf16 %v737_v38, %v733_v36  ;;  %v2643_v45 = vpack.c.bf16 %v744_v40, %v740_v39  ;;  %v739_v46 = vld [vmem:[%s3602_s6 + $0x380] sm:$0xff]  ;;  %v741_v48 = vld [vmem:[%s3602_s6 + $0x390] sm:$0xff] }
  0x9b   : > { %v743_v47 = vld [vmem:[%s3602_s6 + $0x3a0] sm:$0xff]  ;;  %v2771_v49 = vpack.c.bf16 %v746_v42, %v742_v41  ;;  %v745_v50 = vld [vmem:[%s3602_s6 + $0x3b0] sm:$0xff]  ;;  %v748_v51 = vld [vmem:[%s3602_s6 + $0x3c8] sm:$0xff] }
  0x9c   : > { %2626 = vmatpush1.bf16.msra.mxu0 %v2625_v58  ;;  %v752_v52 = vld [vmem:[%s3602_s6 + $0x3e8] sm:$0xff]  ;;  %v750_v53 = vld [vmem:[%s3602_s6 + $0x3d8] sm:$0xff]  ;;  %v2645_v55 = vpack.c.bf16 %v743_v47, %v739_v46  ;;  %v2773_v56 = vpack.c.bf16 %v745_v50, %v741_v48  ;;  %v747_v58 = vld [vmem:[%s3602_s6 + $0x3c0] sm:$0xff] }
  0x9d   : > { %2754 = vmatpush1.bf16.msra.mxu1 %v2753_v59  ;;  %2628 = vmatprep.subr.bf16.mxu0 %v2627_v60  ;;  %v754_v54 = vld [vmem:[%s3602_s6 + $0x3f8] sm:$0xff]  ;;  %v2647_v57 = vpack.c.bf16 %v752_v52, %v748_v51  ;;  %v751_v59 = vld [vmem:[%s3602_s6 + $0x3e0] sm:$0xff]  ;;  %v749_v60 = vld [vmem:[%s3602_s6 + $0x3d0] sm:$0xff] }
  0x9e   : > { %2756 = vmatprep.subr.bf16.mxu1 %v2755_v0  ;;  %v2775_v61 = vpack.c.bf16 %v754_v54, %v750_v53  ;;  %v753_v62 = vld [vmem:[%s3602_s6 + $0x3f0] sm:$0xff]  ;;  %v756_v63 = vld [vmem:[%s3602_s6 + $0x408] sm:$0xff]  ;;  %v758_v1 = vld [vmem:[%s3602_s6 + $0x418] sm:$0xff]  ;;  %v2649_v3 = vpack.c.bf16 %v751_v59, %v747_v58 }
  0x9f   : > { %v760_v0 = vld [vmem:[%s3602_s6 + $0x428] sm:$0xff]  ;;  %v762_v2 = vld [vmem:[%s3602_s6 + $0x438] sm:$0xff]  ;;  %v2777_v4 = vpack.c.bf16 %v753_v62, %v749_v60  ;;  %v759_v7 = vld [vmem:[%s3602_s6 + $0x420] sm:$0xff] }
  0xa0   : > { %2630 = vmatpush1.bf16.msra.mxu0 %v2629_v6  ;;  %v2651_v5 = vpack.c.bf16 %v760_v0, %v756_v63  ;;  %v755_v6 = vld [vmem:[%s3602_s6 + $0x400] sm:$0xff]  ;;  %v761_v10 = vld [vmem:[%s3602_s6 + $0x430] sm:$0xff]  ;;  %v764_v11 = vld [vmem:[%s3602_s6 + $0x448] sm:$0xff] }
  0xa1   : > { %2758 = vmatpush1.bf16.msra.mxu1 %v2757_v8  ;;  %2632 = vmatprep.subr.bf16.mxu0 %v2631_v9  ;;  %v2779_v8 = vpack.c.bf16 %v762_v2, %v758_v1  ;;  %v757_v9 = vld [vmem:[%s3602_s6 + $0x410] sm:$0xff]  ;;  %v768_v12 = vld [vmem:[%s3602_s6 + $0x468] sm:$0xff]  ;;  %v2653_v14 = vpack.c.bf16 %v759_v7, %v755_v6  ;;  %v766_v15 = vld [vmem:[%s3602_s6 + $0x458] sm:$0xff] }
  0xa2   : > { %2760 = vmatprep.subr.bf16.mxu1 %v2759_v13  ;;  %v499_v13 = vld [vmem:[%s3595_s23] sm:$0xff]  ;;  %v770_v16 = vld [vmem:[%s3602_s6 + $0x478] sm:$0xff]  ;;  %v2781_v17 = vpack.c.bf16 %v761_v10, %v757_v9  ;;  %v504_v18 = vld [vmem:[%s3595_s23 + $0x28] sm:$0xff] }
  0xa3   : > { %v765_v22 = vld [vmem:[%s3602_s6 + $0x450] sm:$0xff]  ;;  %v2783_v23 = vpack.c.bf16 %v770_v16, %v766_v15  ;;  %v776_v26 = vld [vmem:[%s3602_s6 + $0x4a8] sm:$0xff]  ;;  %v503_v27 = vld [vmem:[%s3595_s23 + $0x20] sm:$0xff] }
  0xa4   : > { %2634 = vmatpush1.bf16.msra.mxu0 %v2633_v19  ;;  %v2655_v19 = vpack.c.bf16 %v768_v12, %v764_v11  ;;  %v769_v24 = vld [vmem:[%s3602_s6 + $0x470] sm:$0xff]  ;;  %v774_v28 = vld [vmem:[%s3602_s6 + $0x498] sm:$0xff]  ;;  %v508_v30 = vld [vmem:[%s3595_s23 + $0x48] sm:$0xff] }
  0xa5   : > { %2762 = vmatpush1.bf16.msra.mxu1 %v2761_v20  ;;  %2636 = vmatprep.subr.bf16.mxu0 %v2635_v21  ;;  %v763_v20 = vld [vmem:[%s3602_s6 + $0x440] sm:$0xff]  ;;  %v778_v29 = vld [vmem:[%s3602_s6 + $0x4b8] sm:$0xff]  ;;  %v773_v36 = vld [vmem:[%s3602_s6 + $0x490] sm:$0xff] }
  0xa6   : > { %2764 = vmatprep.subr.bf16.mxu1 %v2763_v25  ;;  %v767_v21 = vld [vmem:[%s3602_s6 + $0x460] sm:$0xff]  ;;  %v772_v25 = vld [vmem:[%s3602_s6 + $0x488] sm:$0xff]  ;;  %v777_v38 = vld [vmem:[%s3602_s6 + $0x4b0] sm:$0xff] }
  0xa7   : > { %v771_v34 = vld [vmem:[%s3602_s6 + $0x480] sm:$0xff]  ;;  %v780_v39 = vld [vmem:[%s3602_s6 + $0x4c8] sm:$0xff]  ;;  %v782_v42 = vld [vmem:[%s3602_s6 + $0x4d8] sm:$0xff]  ;;  %v2789_v46 = vpack.c.bf16 %v777_v38, %v773_v36 }
  0xa8   : > { %2638 = vmatpush1.bf16.msra.mxu0 %v2637_v31  ;;  %v2657_v31 = vpack.c.bf16 %v767_v21, %v763_v20  ;;  %v775_v35 = vld [vmem:[%s3602_s6 + $0x4a0] sm:$0xff]  ;;  %v784_v40 = vld [vmem:[%s3602_s6 + $0x4e8] sm:$0xff]  ;;  %v781_v50 = vld [vmem:[%s3602_s6 + $0x4d0] sm:$0xff] }
  0xa9   : > { %2766 = vmatpush1.bf16.msra.mxu1 %v2765_v32  ;;  %2640 = vmatprep.subr.bf16.mxu0 %v2639_v33  ;;  %v2785_v32 = vpack.c.bf16 %v769_v24, %v765_v22  ;;  %v2659_v33 = vpack.c.bf16 %v776_v26, %v772_v25  ;;  %v507_v41 = vld [vmem:[%s3595_s23 + $0x40] sm:$0xff]  ;;  %v2663_v47 = vpack.c.bf16 %v784_v40, %v780_v39  ;;  %v785_v52 = vld [vmem:[%s3602_s6 + $0x4f0] sm:$0xff]  ;;  %v788_v53 = vld [vmem:[%s3602_s6 + $0x508] sm:$0xff] }
  0xaa   : > { %2768 = vmatprep.subr.bf16.mxu1 %v2767_v37  ;;  %v2787_v37 = vpack.c.bf16 %v778_v29, %v774_v28  ;;  %v779_v48 = vld [vmem:[%s3602_s6 + $0x4c0] sm:$0xff]  ;;  %v792_v54 = vld [vmem:[%s3602_s6 + $0x528] sm:$0xff]  ;;  %v2793_v60 = vpack.c.bf16 %v785_v52, %v781_v50  ;;  %v789_v0 = vld [vmem:[%s3602_s6 + $0x510] sm:$0xff] }
  0xab   : > { %v516_v58 = vld [vmem:[%s3595_s23 + $0x88] sm:$0xff]  ;;  %v787_v62 = vld [vmem:[%s3602_s6 + $0x500] sm:$0xff]  ;;  %v793_v2 = vld [vmem:[%s3602_s6 + $0x530] sm:$0xff] }
  0xac   : > { %2642 = vmatpush1.bf16.msra.mxu0 %v2641_v43  ;;  %v786_v43 = vld [vmem:[%s3602_s6 + $0x4f8] sm:$0xff]  ;;  %v791_v63 = vld [vmem:[%s3602_s6 + $0x520] sm:$0xff]  ;;  %v2797_v10 = vpack.c.bf16 %v793_v2, %v789_v0  ;;  %v801_v16 = vld [vmem:[%s3602_s6 + $0x570] sm:$0xff] }
  0xad   : > { %2770 = vmatpush1.bf16.msra.mxu1 %v2769_v44  ;;  %2644 = vmatprep.subr.bf16.mxu0 %v2643_v45  ;;  %v512_v44 = vld [vmem:[%s3595_s23 + $0x68] sm:$0xff]  ;;  %v2661_v45 = vpack.c.bf16 %v775_v35, %v771_v34  ;;  %v2791_v51 = vpack.c.bf16 %v786_v43, %v782_v42  ;;  %v798_v6 = vld [vmem:[%s3602_s6 + $0x558] sm:$0xff]  ;;  %v2669_v9 = vpack.c.bf16 %v791_v63, %v787_v62  ;;  %v795_v12 = vld [vmem:[%s3602_s6 + $0x540] sm:$0xff] }
  0xae   : > { %2772 = vmatprep.subr.bf16.mxu1 %v2771_v49  ;;  %v783_v49 = vld [vmem:[%s3602_s6 + $0x4e0] sm:$0xff]  ;;  %v802_v7 = vld [vmem:[%s3602_s6 + $0x578] sm:$0xff]  ;;  %v524_v22 = vld [vmem:[%s3595_s23 + $0xc8] sm:$0xff] }
  0xaf   : > { %v2665_v59 = vpack.c.bf16 %v783_v49, %v779_v48  ;;  %v2799_v15 = vpack.c.bf16 %v802_v7, %v798_v6  ;;  %v806_v20 = vld [vmem:[%s3602_s6 + $0x598] sm:$0xff]  ;;  %v803_v26 = vld [vmem:[%s3602_s6 + $0x580] sm:$0xff]  ;;  %v805_v28 = vld [vmem:[%s3602_s6 + $0x590] sm:$0xff] }
  0xb0   : > { %2646 = vmatpush1.bf16.msra.mxu0 %v2645_v55  ;;  %v511_v55 = vld [vmem:[%s3595_s23 + $0x60] sm:$0xff]  ;;  %v810_v21 = vld [vmem:[%s3602_s6 + $0x5b8] sm:$0xff]  ;;  %v528_v36 = vld [vmem:[%s3595_s23 + $0xe8] sm:$0xff] }
  0xb1   : > { %2774 = vmatpush1.bf16.msra.mxu1 %v2773_v56  ;;  %2648 = vmatprep.subr.bf16.mxu0 %v2647_v57  ;;  %v790_v56 = vld [vmem:[%s3602_s6 + $0x518] sm:$0xff]  ;;  %v2803_v29 = vpack.c.bf16 %v810_v21, %v806_v20  ;;  %v811_v40 = vld [vmem:[%s3602_s6 + $0x5c0] sm:$0xff]  ;;  %v813_v42 = vld [vmem:[%s3602_s6 + $0x5d0] sm:$0xff] }
  0xb2   : > { %2776 = vmatprep.subr.bf16.mxu1 %v2775_v61  ;;  %v794_v57 = vld [vmem:[%s3602_s6 + $0x538] sm:$0xff]  ;;  %v2667_v61 = vpack.c.bf16 %v792_v54, %v788_v53  ;;  %v532_v50 = vld [vmem:[%s3595_s23 + $0x108] sm:$0xff]  ;;  %v819_v54 = vld [vmem:[%s3602_s6 + $0x600] sm:$0xff] }
  0xb3   : > { %v2795_v1 = vpack.c.bf16 %v794_v57, %v790_v56  ;;  %v814_v34 = vld [vmem:[%s3602_s6 + $0x5d8] sm:$0xff]  ;;  %v821_v56 = vld [vmem:[%s3602_s6 + $0x610] sm:$0xff]  ;;  %v536_v0 = vld [vmem:[%s3595_s23 + $0x128] sm:$0xff] }
  0xb4   : > { %2650 = vmatpush1.bf16.msra.mxu0 %v2649_v3  ;;  %v796_v3 = vld [vmem:[%s3602_s6 + $0x548] sm:$0xff]  ;;  %v818_v35 = vld [vmem:[%s3602_s6 + $0x5f8] sm:$0xff]  ;;  %v829_v6 = vld [vmem:[%s3602_s6 + $0x650] sm:$0xff] }
  0xb5   : > { %2778 = vmatpush1.bf16.msra.mxu1 %v2777_v4  ;;  %2652 = vmatprep.subr.bf16.mxu0 %v2651_v5  ;;  %v800_v4 = vld [vmem:[%s3602_s6 + $0x568] sm:$0xff]  ;;  %v515_v5 = vld [vmem:[%s3595_s23 + $0x80] sm:$0xff]  ;;  %v2807_v43 = vpack.c.bf16 %v818_v35, %v814_v34  ;;  %v822_v48 = vld [vmem:[%s3602_s6 + $0x618] sm:$0xff] }
  0xb6   : > { %2780 = vmatprep.subr.bf16.mxu1 %v2779_v8  ;;  %v520_v8 = vld [vmem:[%s3595_s23 + $0xa8] sm:$0xff]  ;;  %v2671_v11 = vpack.c.bf16 %v800_v4, %v796_v3  ;;  %v826_v49 = vld [vmem:[%s3602_s6 + $0x638] sm:$0xff]  ;;  %v827_v4 = vld [vmem:[%s3602_s6 + $0x640] sm:$0xff] }
  0xb7   : > { %948 = vmatmul.mubr.f32.vlgmr.msra.gmra.mrb[0].mxu0 %v499_v13  ;;  %v2811_v57 = vpack.c.bf16 %v826_v49, %v822_v48  ;;  %v830_v62 = vld [vmem:[%s3602_s6 + $0x658] sm:$0xff]  ;;  %v837_v20 = vld [vmem:[%s3602_s6 + $0x690] sm:$0xff] }
  0xb8   : > { %1462 = vmatmul.mubr.f32.vlgmr.msra.gmra.mrb[0].mxu1 %v499_v13  ;;  %2654 = vmatpush1.bf16.msra.mxu0 %v2653_v14  ;;  %v799_v13 = vld [vmem:[%s3602_s6 + $0x560] sm:$0xff]  ;;  %v797_v14 = vld [vmem:[%s3602_s6 + $0x550] sm:$0xff]  ;;  %v834_v63 = vld [vmem:[%s3602_s6 + $0x678] sm:$0xff] }
  0xb9   : > { %2782 = vmatpush1.bf16.msra.mxu1 %v2781_v17  ;;  %953 = vmatprep.mubr.f32.mxu0 %v504_v18  ;;  %v804_v17 = vld [vmem:[%s3602_s6 + $0x588] sm:$0xff]  ;;  %v2801_v24 = vpack.c.bf16 %v801_v16, %v797_v14  ;;  %v2815_v7 = vpack.c.bf16 %v834_v63, %v830_v62  ;;  %v845_v34 = vld [vmem:[%s3602_s6 + $0x6d0] sm:$0xff] }
  0xba   : > { %1467 = vmatprep.mubr.f32.mxu1 %v504_v18  ;;  %2656 = vmatprep.subr.bf16.mxu0 %v2655_v19  ;;  %v808_v18 = vld [vmem:[%s3602_s6 + $0x5a8] sm:$0xff]  ;;  %v519_v19 = vld [vmem:[%s3595_s23 + $0xa0] sm:$0xff]  ;;  %v853_v48 = vld [vmem:[%s3602_s6 + $0x710] sm:$0xff] }
  0xbb   : > { %954 = vmatmul.mubr.f32.gmra.mrb[2].mxu0 %v503_v27  ;;  %2784 = vmatprep.subr.bf16.mxu1 %v2783_v23  ;;  %v2673_v23 = vpack.c.bf16 %v799_v13, %v795_v12  ;;  %v2675_v25 = vpack.c.bf16 %v808_v18, %v804_v17  ;;  %v838_v12 = vld [vmem:[%s3602_s6 + $0x698] sm:$0xff]  ;;  %v540_v14 = vld [vmem:[%s3595_s23 + $0x148] sm:$0xff]  ;;  %v835_v18 = vld [vmem:[%s3602_s6 + $0x680] sm:$0xff] }
  0xbc   : > { %1468 = vmatmul.mubr.f32.gmra.mrb[2].mxu1 %v503_v27  ;;  %959 = vmatprep.mubr.f32.mxu0 %v508_v30  ;;  %v807_v27 = vld [vmem:[%s3602_s6 + $0x5a0] sm:$0xff]  ;;  %v842_v13 = vld [vmem:[%s3602_s6 + $0x6b8] sm:$0xff]  ;;  %v861_v62 = vld [vmem:[%s3602_s6 + $0x750] sm:$0xff] }
  0xbd   : > { %1473 = vmatprep.mubr.f32.mxu1 %v508_v30  ;;  %2658 = vmatpush1.bf16.msra.mxu0 %v2657_v31  ;;  %v809_v30 = vld [vmem:[%s3602_s6 + $0x5b0] sm:$0xff]  ;;  %v812_v31 = vld [vmem:[%s3602_s6 + $0x5c8] sm:$0xff]  ;;  %v2819_v21 = vpack.c.bf16 %v842_v13, %v838_v12 }
  0xbe   : > { %2786 = vmatpush1.bf16.msra.mxu1 %v2785_v32  ;;  %2660 = vmatprep.subr.bf16.mxu0 %v2659_v33  ;;  %v816_v32 = vld [vmem:[%s3602_s6 + $0x5e8] sm:$0xff]  ;;  %v523_v33 = vld [vmem:[%s3595_s23 + $0xc0] sm:$0xff]  ;;  %v2805_v38 = vpack.c.bf16 %v809_v30, %v805_v28  ;;  %v869_v12 = vld [vmem:[%s3602_s6 + $0x790] sm:$0xff] }
  0xbf   : > { %960 = vmatmul.mubr.f32.gmra.mrb[4].mxu0 %v507_v41  ;;  %2788 = vmatprep.subr.bf16.mxu1 %v2787_v37  ;;  %v2677_v37 = vpack.c.bf16 %v807_v27, %v803_v26  ;;  %v2679_v39 = vpack.c.bf16 %v816_v32, %v812_v31  ;;  %v846_v26 = vld [vmem:[%s3602_s6 + $0x6d8] sm:$0xff]  ;;  %v544_v28 = vld [vmem:[%s3595_s23 + $0x168] sm:$0xff]  ;;  %v843_v32 = vld [vmem:[%s3602_s6 + $0x6c0] sm:$0xff] }
  0xc0   : > { %1474 = vmatmul.mubr.f32.gmra.mrb[4].mxu1 %v507_v41  ;;  %965 = vmatprep.mubr.f32.mxu0 %v512_v44  ;;  %v815_v41 = vld [vmem:[%s3602_s6 + $0x5e0] sm:$0xff]  ;;  %v850_v27 = vld [vmem:[%s3602_s6 + $0x6f8] sm:$0xff] }
  0xc1   : > { %1479 = vmatprep.mubr.f32.mxu1 %v512_v44  ;;  %2662 = vmatpush1.bf16.msra.mxu0 %v2661_v45  ;;  %v817_v44 = vld [vmem:[%s3602_s6 + $0x5f0] sm:$0xff]  ;;  %v820_v45 = vld [vmem:[%s3602_s6 + $0x608] sm:$0xff]  ;;  %v2823_v35 = vpack.c.bf16 %v850_v27, %v846_v26 }
  0xc2   : > { %2790 = vmatpush1.bf16.msra.mxu1 %v2789_v46  ;;  %2664 = vmatprep.subr.bf16.mxu0 %v2663_v47  ;;  %v824_v46 = vld [vmem:[%s3602_s6 + $0x628] sm:$0xff]  ;;  %v527_v47 = vld [vmem:[%s3595_s23 + $0xe0] sm:$0xff]  ;;  %v2809_v52 = vpack.c.bf16 %v817_v44, %v813_v42  ;;  %v877_v27 = vld [vmem:[%s3602_s6 + $0x7d0] sm:$0xff] }
  0xc3   : > { %966 = vmatmul.mubr.f32.gmra.mrb[6].mxu0 %v511_v55  ;;  %2792 = vmatprep.subr.bf16.mxu1 %v2791_v51  ;;  %v2681_v51 = vpack.c.bf16 %v815_v41, %v811_v40  ;;  %v2683_v53 = vpack.c.bf16 %v824_v46, %v820_v45  ;;  %v854_v40 = vld [vmem:[%s3602_s6 + $0x718] sm:$0xff]  ;;  %v548_v42 = vld [vmem:[%s3595_s23 + $0x188] sm:$0xff]  ;;  %v851_v46 = vld [vmem:[%s3602_s6 + $0x700] sm:$0xff] }
  0xc4   : > { %1480 = vmatmul.mubr.f32.gmra.mrb[6].mxu1 %v511_v55  ;;  %971 = vmatprep.mubr.f32.mxu0 %v516_v58  ;;  %v823_v55 = vld [vmem:[%s3602_s6 + $0x620] sm:$0xff]  ;;  %v858_v41 = vld [vmem:[%s3602_s6 + $0x738] sm:$0xff] }
  0xc5   : > { %1485 = vmatprep.mubr.f32.mxu1 %v516_v58  ;;  %2666 = vmatpush1.bf16.msra.mxu0 %v2665_v59  ;;  %v825_v58 = vld [vmem:[%s3602_s6 + $0x630] sm:$0xff]  ;;  %v828_v59 = vld [vmem:[%s3602_s6 + $0x648] sm:$0xff]  ;;  %v2827_v49 = vpack.c.bf16 %v858_v41, %v854_v40  ;;  %v579_v41 = vld [vmem:[%s3595_s23 + $0x280] sm:$0xff] }
  0xc6   : > { %2794 = vmatpush1.bf16.msra.mxu1 %v2793_v60  ;;  %2668 = vmatprep.subr.bf16.mxu0 %v2667_v61  ;;  %v832_v60 = vld [vmem:[%s3602_s6 + $0x668] sm:$0xff]  ;;  %v531_v61 = vld [vmem:[%s3595_s23 + $0x100] sm:$0xff]  ;;  %v2813_v2 = vpack.c.bf16 %v825_v58, %v821_v56 }
  0xc7   : > { %972 = vmatmul.mubr.f32.gmra.mrb[8].mxu0 %v515_v5  ;;  %2796 = vmatprep.subr.bf16.mxu1 %v2795_v1  ;;  %v2685_v1 = vpack.c.bf16 %v823_v55, %v819_v54  ;;  %v2687_v3 = vpack.c.bf16 %v832_v60, %v828_v59  ;;  %v862_v54 = vld [vmem:[%s3602_s6 + $0x758] sm:$0xff]  ;;  %v552_v56 = vld [vmem:[%s3595_s23 + $0x1a8] sm:$0xff]  ;;  %v859_v60 = vld [vmem:[%s3602_s6 + $0x740] sm:$0xff] }
  0xc8   : > { %1486 = vmatmul.mubr.f32.gmra.mrb[8].mxu1 %v515_v5  ;;  %977 = vmatprep.mubr.f32.mxu0 %v520_v8  ;;  %v831_v5 = vld [vmem:[%s3602_s6 + $0x660] sm:$0xff]  ;;  %v866_v55 = vld [vmem:[%s3602_s6 + $0x778] sm:$0xff]  ;;  %v580_v40 = vld [vmem:[%s3595_s23 + $0x288] sm:$0xff] }
  0xc9   : > { %1491 = vmatprep.mubr.f32.mxu1 %v520_v8  ;;  %2670 = vmatpush1.bf16.msra.mxu0 %v2669_v9  ;;  %v833_v8 = vld [vmem:[%s3602_s6 + $0x670] sm:$0xff]  ;;  %v836_v9 = vld [vmem:[%s3602_s6 + $0x688] sm:$0xff]  ;;  %v2831_v63 = vpack.c.bf16 %v866_v55, %v862_v54  ;;  %v607_v55 = vld [vmem:[%s3595_s23 + $0x360] sm:$0xff] }
  0xca   : > { %2798 = vmatpush1.bf16.msra.mxu1 %v2797_v10  ;;  %2672 = vmatprep.subr.bf16.mxu0 %v2671_v11  ;;  %v840_v10 = vld [vmem:[%s3602_s6 + $0x6a8] sm:$0xff]  ;;  %v535_v11 = vld [vmem:[%s3595_s23 + $0x120] sm:$0xff]  ;;  %v2817_v16 = vpack.c.bf16 %v833_v8, %v829_v6 }
  0xcb   : > { %978 = vmatmul.mubr.f32.gmra.mrb[10].mxu0 %v519_v19  ;;  %2800 = vmatprep.subr.bf16.mxu1 %v2799_v15  ;;  %v2689_v15 = vpack.c.bf16 %v831_v5, %v827_v4  ;;  %v2691_v17 = vpack.c.bf16 %v840_v10, %v836_v9  ;;  %v870_v4 = vld [vmem:[%s3602_s6 + $0x798] sm:$0xff]  ;;  %v556_v6 = vld [vmem:[%s3595_s23 + $0x1c8] sm:$0xff]  ;;  %v867_v10 = vld [vmem:[%s3602_s6 + $0x780] sm:$0xff] }
  0xcc   : > { %1492 = vmatmul.mubr.f32.gmra.mrb[10].mxu1 %v519_v19  ;;  %983 = vmatprep.mubr.f32.mxu0 %v524_v22  ;;  %v839_v19 = vld [vmem:[%s3602_s6 + $0x6a0] sm:$0xff]  ;;  %v874_v5 = vld [vmem:[%s3602_s6 + $0x7b8] sm:$0xff]  ;;  %v608_v54 = vld [vmem:[%s3595_s23 + $0x368] sm:$0xff] }
  0xcd   : > { %1497 = vmatprep.mubr.f32.mxu1 %v524_v22  ;;  %2674 = vmatpush1.bf16.msra.mxu0 %v2673_v23  ;;  %v841_v22 = vld [vmem:[%s3602_s6 + $0x6b0] sm:$0xff]  ;;  %v844_v23 = vld [vmem:[%s3602_s6 + $0x6c8] sm:$0xff]  ;;  %v2835_v13 = vpack.c.bf16 %v874_v5, %v870_v4  ;;  %v510_v4 = vld [vmem:[%s3595_s23 + $0x58] sm:$0xff] }
  0xce   : > { %2802 = vmatpush1.bf16.msra.mxu1 %v2801_v24  ;;  %2676 = vmatprep.subr.bf16.mxu0 %v2675_v25  ;;  %v848_v24 = vld [vmem:[%s3602_s6 + $0x6e8] sm:$0xff]  ;;  %v539_v25 = vld [vmem:[%s3595_s23 + $0x140] sm:$0xff]  ;;  %v2821_v30 = vpack.c.bf16 %v841_v22, %v837_v20  ;;  %v509_v5 = vld [vmem:[%s3595_s23 + $0x50] sm:$0xff] }
  0xcf   : > { %984 = vmatmul.mubr.f32.gmra.mrb[12].mxu0 %v523_v33  ;;  %2804 = vmatprep.subr.bf16.mxu1 %v2803_v29  ;;  %v2693_v29 = vpack.c.bf16 %v839_v19, %v835_v18  ;;  %v2695_v31 = vpack.c.bf16 %v848_v24, %v844_v23  ;;  %v878_v18 = vld [vmem:[%s3602_s6 + $0x7d8] sm:$0xff]  ;;  %v560_v20 = vld [vmem:[%s3595_s23 + $0x1e8] sm:$0xff]  ;;  %v875_v24 = vld [vmem:[%s3602_s6 + $0x7c0] sm:$0xff] }
  0xd0   : > { %1498 = vmatmul.mubr.f32.gmra.mrb[12].mxu1 %v523_v33  ;;  %989 = vmatprep.mubr.f32.mxu0 %v528_v36  ;;  %v847_v33 = vld [vmem:[%s3602_s6 + $0x6e0] sm:$0xff]  ;;  %v882_v19 = vld [vmem:[%s3602_s6 + $0x7f8] sm:$0xff] }
  0xd1   : > { %1503 = vmatprep.mubr.f32.mxu1 %v528_v36  ;;  %2678 = vmatpush1.bf16.msra.mxu0 %v2677_v37  ;;  %v849_v36 = vld [vmem:[%s3602_s6 + $0x6f0] sm:$0xff]  ;;  %v852_v37 = vld [vmem:[%s3602_s6 + $0x708] sm:$0xff]  ;;  %v2839_v26 = vpack.c.bf16 %v882_v19, %v878_v18  ;;  %v538_v18 = vld [vmem:[%s3595_s23 + $0x138] sm:$0xff] }
  0xd2   : > { %2806 = vmatpush1.bf16.msra.mxu1 %v2805_v38  ;;  %2680 = vmatprep.subr.bf16.mxu0 %v2679_v39  ;;  %v856_v38 = vld [vmem:[%s3602_s6 + $0x728] sm:$0xff]  ;;  %v543_v39 = vld [vmem:[%s3595_s23 + $0x160] sm:$0xff]  ;;  %v2825_v44 = vpack.c.bf16 %v849_v36, %v845_v34  ;;  %v537_v19 = vld [vmem:[%s3595_s23 + $0x130] sm:$0xff] }
  0xd3   : > { %990 = vmatmul.mubr.f32.gmra.mrb[14].mxu0 %v527_v47  ;;  %2808 = vmatprep.subr.bf16.mxu1 %v2807_v43  ;;  %v2697_v43 = vpack.c.bf16 %v847_v33, %v843_v32  ;;  %v2699_v45 = vpack.c.bf16 %v856_v38, %v852_v37  ;;  %v563_v33 = vld [vmem:[%s3595_s23 + $0x200] sm:$0xff]  ;;  %v568_v34 = vld [vmem:[%s3595_s23 + $0x228] sm:$0xff] }
  0xd4   : > { %1504 = vmatmul.mubr.f32.gmra.mrb[14].mxu1 %v527_v47  ;;  %995 = vmatprep.mubr.f32.mxu0 %v532_v50  ;;  %v855_v47 = vld [vmem:[%s3602_s6 + $0x720] sm:$0xff]  ;;  %v572_v36 = vld [vmem:[%s3595_s23 + $0x248] sm:$0xff] }
  0xd5   : > { %1509 = vmatprep.mubr.f32.mxu1 %v532_v50  ;;  %2682 = vmatpush1.bf16.msra.mxu0 %v2681_v51  ;;  %v857_v50 = vld [vmem:[%s3602_s6 + $0x730] sm:$0xff]  ;;  %v860_v51 = vld [vmem:[%s3602_s6 + $0x748] sm:$0xff]  ;;  %v571_v37 = vld [vmem:[%s3595_s23 + $0x240] sm:$0xff] }
  0xd6   : > { %2810 = vmatpush1.bf16.msra.mxu1 %v2809_v52  ;;  %2684 = vmatprep.subr.bf16.mxu0 %v2683_v53  ;;  %v864_v52 = vld [vmem:[%s3602_s6 + $0x768] sm:$0xff]  ;;  %v547_v53 = vld [vmem:[%s3595_s23 + $0x180] sm:$0xff]  ;;  %v2829_v58 = vpack.c.bf16 %v857_v50, %v853_v48 }
  0xd7   : > { %996 = vmatmul.mubr.f32.gmra.mrb[16].mxu0 %v531_v61  ;;  %2812 = vmatprep.subr.bf16.mxu1 %v2811_v57  ;;  %v2701_v57 = vpack.c.bf16 %v855_v47, %v851_v46  ;;  %v2703_v59 = vpack.c.bf16 %v864_v52, %v860_v51  ;;  %v576_v38 = vld [vmem:[%s3595_s23 + $0x268] sm:$0xff]  ;;  %v591_v47 = vld [vmem:[%s3595_s23 + $0x2e0] sm:$0xff] }
  0xd8   : > { %1510 = vmatmul.mubr.f32.gmra.mrb[16].mxu1 %v531_v61  ;;  %1001 = vmatprep.mubr.f32.mxu0 %v536_v0  ;;  %v863_v61 = vld [vmem:[%s3602_s6 + $0x760] sm:$0xff]  ;;  %v592_v46 = vld [vmem:[%s3595_s23 + $0x2e8] sm:$0xff] }
  0xd9   : > { %1515 = vmatprep.mubr.f32.mxu1 %v536_v0  ;;  %2686 = vmatpush1.bf16.msra.mxu0 %v2685_v1  ;;  %v865_v0 = vld [vmem:[%s3602_s6 + $0x770] sm:$0xff]  ;;  %v868_v1 = vld [vmem:[%s3602_s6 + $0x788] sm:$0xff]  ;;  %v599_v51 = vld [vmem:[%s3595_s23 + $0x320] sm:$0xff] }
  0xda   : > { %2814 = vmatpush1.bf16.msra.mxu1 %v2813_v2  ;;  %2688 = vmatprep.subr.bf16.mxu0 %v2687_v3  ;;  %v872_v2 = vld [vmem:[%s3602_s6 + $0x7a8] sm:$0xff]  ;;  %v551_v3 = vld [vmem:[%s3595_s23 + $0x1a0] sm:$0xff]  ;;  %v2833_v8 = vpack.c.bf16 %v865_v0, %v861_v62  ;;  %v502_v0 = vld [vmem:[%s3595_s23 + $0x18] sm:$0xff] }
  0xdb   : > { %1002 = vmatmul.mubr.f32.gmra.mrb[18].mxu0 %v535_v11  ;;  %2816 = vmatprep.subr.bf16.mxu1 %v2815_v7  ;;  %v2705_v7 = vpack.c.bf16 %v863_v61, %v859_v60  ;;  %v2707_v9 = vpack.c.bf16 %v872_v2, %v868_v1  ;;  %v596_v48 = vld [vmem:[%s3595_s23 + $0x308] sm:$0xff]  ;;  %v619_v61 = vld [vmem:[%s3595_s23 + $0x3c0] sm:$0xff]  ;;  %v501_v1 = vld [vmem:[%s3595_s23 + $0x10] sm:$0xff] }
  0xdc   : > { %1516 = vmatmul.mubr.f32.gmra.mrb[18].mxu1 %v535_v11  ;;  %1007 = vmatprep.mubr.f32.mxu0 %v540_v14  ;;  %v871_v11 = vld [vmem:[%s3602_s6 + $0x7a0] sm:$0xff]  ;;  %v600_v50 = vld [vmem:[%s3595_s23 + $0x328] sm:$0xff]  ;;  %v506_v2 = vld [vmem:[%s3595_s23 + $0x38] sm:$0xff] }
  0xdd   : > { %1521 = vmatprep.mubr.f32.mxu1 %v540_v14  ;;  %2690 = vmatpush1.bf16.msra.mxu0 %v2689_v15  ;;  %v873_v14 = vld [vmem:[%s3602_s6 + $0x7b0] sm:$0xff]  ;;  %v876_v15 = vld [vmem:[%s3602_s6 + $0x7c8] sm:$0xff] }
  0xde   : > { %2818 = vmatpush1.bf16.msra.mxu1 %v2817_v16  ;;  %2692 = vmatprep.subr.bf16.mxu0 %v2691_v17  ;;  %v880_v16 = vld [vmem:[%s3602_s6 + $0x7e8] sm:$0xff]  ;;  %v555_v17 = vld [vmem:[%s3595_s23 + $0x1c0] sm:$0xff]  ;;  %v2837_v22 = vpack.c.bf16 %v873_v14, %v869_v12  ;;  %v526_v12 = vld [vmem:[%s3595_s23 + $0xd8] sm:$0xff] }
  0xdf   : > { %1008 = vmatmul.mubr.f32.gmra.mrb[20].mxu0 %v539_v25  ;;  %2820 = vmatprep.subr.bf16.mxu1 %v2819_v21  ;;  %v2709_v21 = vpack.c.bf16 %v871_v11, %v867_v10  ;;  %v2711_v23 = vpack.c.bf16 %v880_v16, %v876_v15  ;;  %v604_v52 = vld [vmem:[%s3595_s23 + $0x348] sm:$0xff]  ;;  %v522_v10 = vld [vmem:[%s3595_s23 + $0xb8] sm:$0xff]  ;;  %v521_v11 = vld [vmem:[%s3595_s23 + $0xb0] sm:$0xff] }
  0xe0   : > { %1522 = vmatmul.mubr.f32.gmra.mrb[20].mxu1 %v539_v25  ;;  %1013 = vmatprep.mubr.f32.mxu0 %v544_v28  ;;  %v879_v25 = vld [vmem:[%s3602_s6 + $0x7e0] sm:$0xff]  ;;  %v620_v60 = vld [vmem:[%s3595_s23 + $0x3c8] sm:$0xff]  ;;  %v530_v14 = vld [vmem:[%s3595_s23 + $0xf8] sm:$0xff] }
  0xe1   : > { %1527 = vmatprep.mubr.f32.mxu1 %v544_v28  ;;  %2694 = vmatpush1.bf16.msra.mxu0 %v2693_v29  ;;  %v881_v28 = vld [vmem:[%s3602_s6 + $0x7f0] sm:$0xff]  ;;  %v559_v29 = vld [vmem:[%s3595_s23 + $0x1e0] sm:$0xff]  ;;  %v624_v62 = vld [vmem:[%s3595_s23 + $0x3e8] sm:$0xff]  ;;  %s3173_s6 = sshll.u32 %s3326_s2, 4  ;;  %s3174_s6 = int_to_ptr.vmem [resolvable:$false] %s3173_s6 }
  0xe2   : > { %2822 = vmatpush1.bf16.msra.mxu1 %v2821_v30  ;;  %2696 = vmatprep.subr.bf16.mxu0 %v2695_v31  ;;  %v564_v30 = vld [vmem:[%s3595_s23 + $0x208] sm:$0xff]  ;;  %v2713_v31 = vpack.c.bf16 %v879_v25, %v875_v24  ;;  %v2841_v32 = vpack.c.bf16 %v881_v28, %v877_v27  ;;  %v529_v15 = vld [vmem:[%s3595_s23 + $0xf0] sm:$0xff]  ;;  %v534_v16 = vld [vmem:[%s3595_s23 + $0x118] sm:$0xff]  ;;  %s3175_s7 = scalar_lea.vmem %s3174_s6, 32768  ;;  %p3176_p4 = scmp.lt.s32.totalorder %s4129_s18, %s3174_s6 }
  0xe3   : > { %1014 = vmatmul.mubr.f32.gmra.mrb[22].mxu0 %v543_v39  ;;  %2824 = vmatprep.subr.bf16.mxu1 %v2823_v35  ;;  %v567_v35 = vld [vmem:[%s3595_s23 + $0x220] sm:$0xff]  ;;  %v550_v24 = vld [vmem:[%s3595_s23 + $0x198] sm:$0xff]  ;;  %v549_v25 = vld [vmem:[%s3595_s23 + $0x190] sm:$0xff]  ;;  %p3177_p10 = scmp.lt.s32.totalorder %s3175_s7, %s3169_s25 }
  0xe4   : > { %1528 = vmatmul.mubr.f32.gmra.mrb[22].mxu1 %v543_v39  ;;  %1019 = vmatprep.mubr.f32.mxu0 %v548_v42  ;;  %v575_v39 = vld [vmem:[%s3595_s23 + $0x260] sm:$0xff]  ;;  %v553_v27 = vld [vmem:[%s3595_s23 + $0x1b0] sm:$0xff]  ;;  %v558_v28 = vld [vmem:[%s3595_s23 + $0x1d8] sm:$0xff] }
  0xe5   : > { %1533 = vmatprep.mubr.f32.mxu1 %v548_v42  ;;  %2698 = vmatpush1.bf16.msra.mxu0 %v2697_v43  ;;  %v584_v42 = vld [vmem:[%s3595_s23 + $0x2a8] sm:$0xff]  ;;  %v583_v43 = vld [vmem:[%s3595_s23 + $0x2a0] sm:$0xff]  ;;  %p3178_p8 = por %p3177_p10, %p3176_p4 }
  0xe6   : > { %2826 = vmatpush1.bf16.msra.mxu1 %v2825_v44  ;;  %2700 = vmatprep.subr.bf16.mxu0 %v2699_v45  ;;  %v588_v44 = vld [vmem:[%s3595_s23 + $0x2c8] sm:$0xff]  ;;  %v587_v45 = vld [vmem:[%s3595_s23 + $0x2c0] sm:$0xff] }
  0xe7   : > { %1020 = vmatmul.mubr.f32.gmra.mrb[24].mxu0 %v547_v53  ;;  %2828 = vmatprep.subr.bf16.mxu1 %v2827_v49  ;;  %v595_v49 = vld [vmem:[%s3595_s23 + $0x300] sm:$0xff]  ;;  %p3179_p11 = pnand %p3178_p8, %p3172_p0 }
  0xe8   : > { %1534 = vmatmul.mubr.f32.gmra.mrb[24].mxu1 %v547_v53  ;;  %1025 = vmatprep.mubr.f32.mxu0 %v552_v56  ;;  %v603_v53 = vld [vmem:[%s3595_s23 + $0x340] sm:$0xff] }
  0xe9   : > { %1539 = vmatprep.mubr.f32.mxu1 %v552_v56  ;;  %2702 = vmatpush1.bf16.msra.mxu0 %v2701_v57  ;;  %v612_v56 = vld [vmem:[%s3595_s23 + $0x388] sm:$0xff]  ;;  %v611_v57 = vld [vmem:[%s3595_s23 + $0x380] sm:$0xff] }
  0xea   : > { %2830 = vmatpush1.bf16.msra.mxu1 %v2829_v58  ;;  %2704 = vmatprep.subr.bf16.mxu0 %v2703_v59  ;;  %v616_v58 = vld [vmem:[%s3595_s23 + $0x3a8] sm:$0xff]  ;;  %v615_v59 = vld [vmem:[%s3595_s23 + $0x3a0] sm:$0xff] }
  0xeb   : > { %1026 = vmatmul.mubr.f32.gmra.mrb[26].mxu0 %v551_v3  ;;  %2832 = vmatprep.subr.bf16.mxu1 %v2831_v63  ;;  %v623_v63 = vld [vmem:[%s3595_s23 + $0x3e0] sm:$0xff] }
  0xec   : > { %1540 = vmatmul.mubr.f32.gmra.mrb[26].mxu1 %v551_v3  ;;  %1031 = vmatprep.mubr.f32.mxu0 %v556_v6  ;;  %v505_v3 = vld [vmem:[%s3595_s23 + $0x30] sm:$0xff] }
  0xed   : > { %1545 = vmatprep.mubr.f32.mxu1 %v556_v6  ;;  %2706 = vmatpush1.bf16.msra.mxu0 %v2705_v7  ;;  %v514_v6 = vld [vmem:[%s3595_s23 + $0x78] sm:$0xff]  ;;  %v513_v7 = vld [vmem:[%s3595_s23 + $0x70] sm:$0xff] }
  0xee   : > { %2834 = vmatpush1.bf16.msra.mxu1 %v2833_v8  ;;  %2708 = vmatprep.subr.bf16.mxu0 %v2707_v9  ;;  %v518_v8 = vld [vmem:[%s3595_s23 + $0x98] sm:$0xff]  ;;  %v517_v9 = vld [vmem:[%s3595_s23 + $0x90] sm:$0xff] }
  0xef   : > { %1032 = vmatmul.mubr.f32.gmra.mrb[28].mxu0 %v555_v17  ;;  %2836 = vmatprep.subr.bf16.mxu1 %v2835_v13  ;;  %v525_v13 = vld [vmem:[%s3595_s23 + $0xd0] sm:$0xff] }
  0xf0   : > { %1546 = vmatmul.mubr.f32.gmra.mrb[28].mxu1 %v555_v17  ;;  %1037 = vmatprep.mubr.f32.mxu0 %v560_v20  ;;  %v533_v17 = vld [vmem:[%s3595_s23 + $0x110] sm:$0xff] }
  0xf1   : > { %1551 = vmatprep.mubr.f32.mxu1 %v560_v20  ;;  %2710 = vmatpush1.bf16.msra.mxu0 %v2709_v21  ;;  %v542_v20 = vld [vmem:[%s3595_s23 + $0x158] sm:$0xff]  ;;  %v541_v21 = vld [vmem:[%s3595_s23 + $0x150] sm:$0xff] }
  0xf2   : > { %2838 = vmatpush1.bf16.msra.mxu1 %v2837_v22  ;;  %2712 = vmatprep.subr.bf16.mxu0 %v2711_v23  ;;  %v546_v22 = vld [vmem:[%s3595_s23 + $0x178] sm:$0xff]  ;;  %v545_v23 = vld [vmem:[%s3595_s23 + $0x170] sm:$0xff] }
  0xf3   : > { %1038 = vmatmul.mubr.f32.gmra.mrb[30].mxu0 %v559_v29  ;;  %2840 = vmatprep.subr.bf16.mxu1 %v2839_v26  ;;  %v554_v26 = vld [vmem:[%s3595_s23 + $0x1b8] sm:$0xff] }
  0xf4   : > { %1552 = vmatmul.mubr.f32.gmra.mrb[30].mxu1 %v559_v29  ;;  %1043 = vmatprep.mubr.f32.mxu0 %v564_v30  ;;  %v557_v29 = vld [vmem:[%s3595_s23 + $0x1d0] sm:$0xff] }
  0xf5   : > { %1557 = vmatprep.mubr.f32.mxu1 %v564_v30  ;;  %2714 = vmatpush1.bf16.msra.mxu0 %v2713_v31  ;;  %v562_v30 = vld [vmem:[%s3595_s23 + $0x1f8] sm:$0xff]  ;;  %v561_v31 = vld [vmem:[%s3595_s23 + $0x1f0] sm:$0xff] }
  0xf6   : > { %2842 = vmatpush1.bf16.msra.mxu1 %v2841_v32  ;;  %v566_v32 = vld [vmem:[%s3595_s23 + $0x218] sm:$0xff] }
  0xf7   : > { %1044 = vmatmul.mubr.f32.gmra.mrb[32].mxu0 %v563_v33 }
  0xf8   : > { %1558 = vmatmul.mubr.f32.gmra.mrb[32].mxu1 %v563_v33  ;;  %1049 = vmatprep.mubr.f32.mxu0 %v568_v34  ;;  %v565_v33 = vld [vmem:[%s3595_s23 + $0x210] sm:$0xff] }
  0xf9   : > { %1563 = vmatprep.mubr.f32.mxu1 %v568_v34  ;;  %v570_v34 = vld [vmem:[%s3595_s23 + $0x238] sm:$0xff] }
  0xfb   : > { %1050 = vmatmul.mubr.f32.gmra.mrb[34].mxu0 %v567_v35 }
  0xfc   : > { %1564 = vmatmul.mubr.f32.gmra.mrb[34].mxu1 %v567_v35  ;;  %1055 = vmatprep.mubr.f32.mxu0 %v572_v36  ;;  %v569_v35 = vld [vmem:[%s3595_s23 + $0x230] sm:$0xff] }
  0xfd   : > { %1569 = vmatprep.mubr.f32.mxu1 %v572_v36  ;;  %v574_v36 = vld [vmem:[%s3595_s23 + $0x258] sm:$0xff] }
  0xff   : > { %1056 = vmatmul.mubr.f32.gmra.mrb[36].mxu0 %v571_v37 }
 0x100   : > { %1570 = vmatmul.mubr.f32.gmra.mrb[36].mxu1 %v571_v37  ;;  %1061 = vmatprep.mubr.f32.mxu0 %v576_v38  ;;  %v573_v37 = vld [vmem:[%s3595_s23 + $0x250] sm:$0xff] }
 0x101   : > { %1575 = vmatprep.mubr.f32.mxu1 %v576_v38  ;;  %v578_v38 = vld [vmem:[%s3595_s23 + $0x278] sm:$0xff] }
 0x103   : > { %1062 = vmatmul.mubr.f32.gmra.mrb[38].mxu0 %v575_v39 }
 0x104   : > { %1576 = vmatmul.mubr.f32.gmra.mrb[38].mxu1 %v575_v39  ;;  %1067 = vmatprep.mubr.f32.mxu0 %v580_v40  ;;  %v577_v39 = vld [vmem:[%s3595_s23 + $0x270] sm:$0xff] }
 0x105   : > { %1581 = vmatprep.mubr.f32.mxu1 %v580_v40  ;;  %v582_v40 = vld [vmem:[%s3595_s23 + $0x298] sm:$0xff] }
 0x107   : > { %1068 = vmatmul.mubr.f32.gmra.mrb[40].mxu0 %v579_v41 }
 0x108   : > { %1582 = vmatmul.mubr.f32.gmra.mrb[40].mxu1 %v579_v41  ;;  %1073 = vmatprep.mubr.f32.mxu0 %v584_v42  ;;  %v581_v41 = vld [vmem:[%s3595_s23 + $0x290] sm:$0xff] }
 0x109   : > { %1587 = vmatprep.mubr.f32.mxu1 %v584_v42  ;;  %v586_v42 = vld [vmem:[%s3595_s23 + $0x2b8] sm:$0xff] }
 0x10b   : > { %1074 = vmatmul.mubr.f32.gmra.mrb[42].mxu0 %v583_v43 }
 0x10c   : > { %1588 = vmatmul.mubr.f32.gmra.mrb[42].mxu1 %v583_v43  ;;  %1079 = vmatprep.mubr.f32.mxu0 %v588_v44  ;;  %v585_v43 = vld [vmem:[%s3595_s23 + $0x2b0] sm:$0xff] }
 0x10d   : > { %1593 = vmatprep.mubr.f32.mxu1 %v588_v44  ;;  %v590_v44 = vld [vmem:[%s3595_s23 + $0x2d8] sm:$0xff] }
 0x10f   : > { %1080 = vmatmul.mubr.f32.gmra.mrb[44].mxu0 %v587_v45 }
 0x110   : > { %1594 = vmatmul.mubr.f32.gmra.mrb[44].mxu1 %v587_v45  ;;  %1085 = vmatprep.mubr.f32.mxu0 %v592_v46  ;;  %v589_v45 = vld [vmem:[%s3595_s23 + $0x2d0] sm:$0xff] }
 0x111   : > { %1599 = vmatprep.mubr.f32.mxu1 %v592_v46  ;;  %v594_v46 = vld [vmem:[%s3595_s23 + $0x2f8] sm:$0xff] }
 0x113   : > { %1086 = vmatmul.mubr.f32.gmra.mrb[46].mxu0 %v591_v47 }
 0x114   : > { %1600 = vmatmul.mubr.f32.gmra.mrb[46].mxu1 %v591_v47  ;;  %1091 = vmatprep.mubr.f32.mxu0 %v596_v48  ;;  %v593_v47 = vld [vmem:[%s3595_s23 + $0x2f0] sm:$0xff] }
 0x115   : > { %1605 = vmatprep.mubr.f32.mxu1 %v596_v48  ;;  %v598_v48 = vld [vmem:[%s3595_s23 + $0x318] sm:$0xff] }
 0x117   : > { %1092 = vmatmul.mubr.f32.gmra.mrb[48].mxu0 %v595_v49 }
 0x118   : > { %1606 = vmatmul.mubr.f32.gmra.mrb[48].mxu1 %v595_v49  ;;  %1097 = vmatprep.mubr.f32.mxu0 %v600_v50  ;;  %v597_v49 = vld [vmem:[%s3595_s23 + $0x310] sm:$0xff] }
 0x119   : > { %1611 = vmatprep.mubr.f32.mxu1 %v600_v50  ;;  %v602_v50 = vld [vmem:[%s3595_s23 + $0x338] sm:$0xff] }
 0x11b   : > { %1098 = vmatmul.mubr.f32.gmra.mrb[50].mxu0 %v599_v51 }
 0x11c   : > { %1612 = vmatmul.mubr.f32.gmra.mrb[50].mxu1 %v599_v51  ;;  %1103 = vmatprep.mubr.f32.mxu0 %v604_v52  ;;  %v601_v51 = vld [vmem:[%s3595_s23 + $0x330] sm:$0xff] }
 0x11d   : > { %1617 = vmatprep.mubr.f32.mxu1 %v604_v52  ;;  %v606_v52 = vld [vmem:[%s3595_s23 + $0x358] sm:$0xff] }
 0x11f   : > { %1104 = vmatmul.mubr.f32.gmra.mrb[52].mxu0 %v603_v53 }
 0x120   : > { %1618 = vmatmul.mubr.f32.gmra.mrb[52].mxu1 %v603_v53  ;;  %1109 = vmatprep.mubr.f32.mxu0 %v608_v54  ;;  %v605_v53 = vld [vmem:[%s3595_s23 + $0x350] sm:$0xff] }
 0x121   : > { %1623 = vmatprep.mubr.f32.mxu1 %v608_v54  ;;  %v610_v54 = vld [vmem:[%s3595_s23 + $0x378] sm:$0xff] }
 0x123   : > { %1110 = vmatmul.mubr.f32.gmra.mrb[54].mxu0 %v607_v55 }
 0x124   : > { %1624 = vmatmul.mubr.f32.gmra.mrb[54].mxu1 %v607_v55  ;;  %1115 = vmatprep.mubr.f32.mxu0 %v612_v56  ;;  %v609_v55 = vld [vmem:[%s3595_s23 + $0x370] sm:$0xff] }
 0x125   : > { %1629 = vmatprep.mubr.f32.mxu1 %v612_v56  ;;  %v614_v56 = vld [vmem:[%s3595_s23 + $0x398] sm:$0xff] }
 0x127   : > { %1116 = vmatmul.mubr.f32.gmra.mrb[56].mxu0 %v611_v57 }
 0x128   : > { %1630 = vmatmul.mubr.f32.gmra.mrb[56].mxu1 %v611_v57  ;;  %1121 = vmatprep.mubr.f32.mxu0 %v616_v58  ;;  %v613_v57 = vld [vmem:[%s3595_s23 + $0x390] sm:$0xff] }
 0x129   : > { %1635 = vmatprep.mubr.f32.mxu1 %v616_v58  ;;  %v618_v58 = vld [vmem:[%s3595_s23 + $0x3b8] sm:$0xff] }
 0x12b   : > { %1122 = vmatmul.mubr.f32.gmra.mrb[58].mxu0 %v615_v59 }
 0x12c   : > { %1636 = vmatmul.mubr.f32.gmra.mrb[58].mxu1 %v615_v59  ;;  %1127 = vmatprep.mubr.f32.mxu0 %v620_v60  ;;  %v617_v59 = vld [vmem:[%s3595_s23 + $0x3b0] sm:$0xff] }
 0x12d   : > { %1641 = vmatprep.mubr.f32.mxu1 %v620_v60  ;;  %v622_v60 = vld [vmem:[%s3595_s23 + $0x3d8] sm:$0xff] }
 0x12f   : > { %1128 = vmatmul.mubr.f32.gmra.mrb[60].mxu0 %v619_v61 }
 0x130   : > { %1642 = vmatmul.mubr.f32.gmra.mrb[60].mxu1 %v619_v61  ;;  %1133 = vmatprep.mubr.f32.mxu0 %v624_v62  ;;  %v621_v61 = vld [vmem:[%s3595_s23 + $0x3d0] sm:$0xff] }
 0x131   : > { %1647 = vmatprep.mubr.f32.mxu1 %v624_v62  ;;  %v626_v62 = vld [vmem:[%s3595_s23 + $0x3f8] sm:$0xff] }
 0x133   : > { %1134 = vmatmul.mubr.f32.gmra.mrb[62].mxu0 %v623_v63 }
 0x134   : > { %1648 = vmatmul.mubr.f32.gmra.mrb[62].mxu1 %v623_v63  ;;  %1204 = vmatprep.mubr.f32.mxu0 %v502_v0  ;;  %v625_v63 = vld [vmem:[%s3595_s23 + $0x3f0] sm:$0xff]  ;;  %s4127_s23 = scalar_lea.hbm %s4258_s8, %s2581_s19 }
 0x135   : > { %1718 = vmatprep.mubr.f32.mxu1 %v502_v0 }
 0x137   : > { %1205 = vmatmul.mubr.f32.vlgmr.msra.gmra.mrb[0].mxu0 %v501_v1 }
 0x138   : > { %1719 = vmatmul.mubr.f32.vlgmr.msra.gmra.mrb[0].mxu1 %v501_v1  ;;  %1210 = vmatprep.mubr.f32.mxu0 %v506_v2 }
 0x139   : > { %1724 = vmatprep.mubr.f32.mxu1 %v506_v2 }
 0x13b   : > { %1211 = vmatmul.mubr.f32.gmra.mrb[2].mxu0 %v505_v3 }
 0x13c   : > { %1725 = vmatmul.mubr.f32.gmra.mrb[2].mxu1 %v505_v3  ;;  %1216 = vmatprep.mubr.f32.mxu0 %v510_v4 }
 0x13d   : > { %1730 = vmatprep.mubr.f32.mxu1 %v510_v4 }
 0x13f   : > { %1217 = vmatmul.mubr.f32.gmra.mrb[4].mxu0 %v509_v5 }
 0x140   : > { %1731 = vmatmul.mubr.f32.gmra.mrb[4].mxu1 %v509_v5  ;;  %1222 = vmatprep.mubr.f32.mxu0 %v514_v6 }
 0x141   : > { %1736 = vmatprep.mubr.f32.mxu1 %v514_v6 }
 0x143   : > { %1223 = vmatmul.mubr.f32.gmra.mrb[6].mxu0 %v513_v7 }
 0x144   : > { %1737 = vmatmul.mubr.f32.gmra.mrb[6].mxu1 %v513_v7  ;;  %1228 = vmatprep.mubr.f32.mxu0 %v518_v8 }
 0x145   : > { %1742 = vmatprep.mubr.f32.mxu1 %v518_v8 }
 0x147   : > { %1229 = vmatmul.mubr.f32.gmra.mrb[8].mxu0 %v517_v9 }
 0x148   : > { %1743 = vmatmul.mubr.f32.gmra.mrb[8].mxu1 %v517_v9  ;;  %1234 = vmatprep.mubr.f32.mxu0 %v522_v10 }
 0x149   : > { %1748 = vmatprep.mubr.f32.mxu1 %v522_v10 }
 0x14b   : > { %1235 = vmatmul.mubr.f32.gmra.mrb[10].mxu0 %v521_v11 }
 0x14c   : > { %1749 = vmatmul.mubr.f32.gmra.mrb[10].mxu1 %v521_v11  ;;  %1240 = vmatprep.mubr.f32.mxu0 %v526_v12 }
 0x14d   : > { %1754 = vmatprep.mubr.f32.mxu1 %v526_v12 }
 0x14f   : > { %1241 = vmatmul.mubr.f32.gmra.mrb[12].mxu0 %v525_v13 }
 0x150   : > { %1755 = vmatmul.mubr.f32.gmra.mrb[12].mxu1 %v525_v13  ;;  %1246 = vmatprep.mubr.f32.mxu0 %v530_v14 }
 0x151   : > { %1760 = vmatprep.mubr.f32.mxu1 %v530_v14 }
 0x153   : > { %1247 = vmatmul.mubr.f32.gmra.mrb[14].mxu0 %v529_v15 }
 0x154   : > { %1761 = vmatmul.mubr.f32.gmra.mrb[14].mxu1 %v529_v15  ;;  %1252 = vmatprep.mubr.f32.mxu0 %v534_v16 }
 0x155   : > { %1766 = vmatprep.mubr.f32.mxu1 %v534_v16 }
 0x157   : > { %1253 = vmatmul.mubr.f32.gmra.mrb[16].mxu0 %v533_v17 }
 0x158   : > { %1767 = vmatmul.mubr.f32.gmra.mrb[16].mxu1 %v533_v17  ;;  %1258 = vmatprep.mubr.f32.mxu0 %v538_v18 }
 0x159   : > { %1772 = vmatprep.mubr.f32.mxu1 %v538_v18 }
 0x15b   : > { %1259 = vmatmul.mubr.f32.gmra.mrb[18].mxu0 %v537_v19 }
 0x15c   : > { %1773 = vmatmul.mubr.f32.gmra.mrb[18].mxu1 %v537_v19  ;;  %1264 = vmatprep.mubr.f32.mxu0 %v542_v20 }
 0x15d   : > { %1778 = vmatprep.mubr.f32.mxu1 %v542_v20 }
 0x15f   : > { %1265 = vmatmul.mubr.f32.gmra.mrb[20].mxu0 %v541_v21 }
 0x160   : > { %1779 = vmatmul.mubr.f32.gmra.mrb[20].mxu1 %v541_v21  ;;  %1270 = vmatprep.mubr.f32.mxu0 %v546_v22 }
 0x161   : > { %1784 = vmatprep.mubr.f32.mxu1 %v546_v22 }
 0x163   : > { %1271 = vmatmul.mubr.f32.gmra.mrb[22].mxu0 %v545_v23 }
 0x164   : > { %1785 = vmatmul.mubr.f32.gmra.mrb[22].mxu1 %v545_v23  ;;  %1276 = vmatprep.mubr.f32.mxu0 %v550_v24 }
 0x165   : > { %1790 = vmatprep.mubr.f32.mxu1 %v550_v24 }
 0x167   : > { %1277 = vmatmul.mubr.f32.gmra.mrb[24].mxu0 %v549_v25 }
 0x168   : > { %1791 = vmatmul.mubr.f32.gmra.mrb[24].mxu1 %v549_v25  ;;  %1282 = vmatprep.mubr.f32.mxu0 %v554_v26 }
 0x169   : > { %1796 = vmatprep.mubr.f32.mxu1 %v554_v26 }
 0x16b   : > { %1283 = vmatmul.mubr.f32.gmra.mrb[26].mxu0 %v553_v27 }
 0x16c   : > { %1797 = vmatmul.mubr.f32.gmra.mrb[26].mxu1 %v553_v27  ;;  %1288 = vmatprep.mubr.f32.mxu0 %v558_v28 }
 0x16d   : > { %1802 = vmatprep.mubr.f32.mxu1 %v558_v28 }
 0x16f   : > { %1289 = vmatmul.mubr.f32.gmra.mrb[28].mxu0 %v557_v29 }
 0x170   : > { %1803 = vmatmul.mubr.f32.gmra.mrb[28].mxu1 %v557_v29  ;;  %1294 = vmatprep.mubr.f32.mxu0 %v562_v30 }
 0x171   : > { %1808 = vmatprep.mubr.f32.mxu1 %v562_v30 }
 0x173   : > { %1295 = vmatmul.mubr.f32.gmra.mrb[30].mxu0 %v561_v31 }
 0x174   : > { %1809 = vmatmul.mubr.f32.gmra.mrb[30].mxu1 %v561_v31  ;;  %1300 = vmatprep.mubr.f32.mxu0 %v566_v32 }
 0x175   : > { %1814 = vmatprep.mubr.f32.mxu1 %v566_v32 }
 0x177   : > { %1301 = vmatmul.mubr.f32.gmra.mrb[32].mxu0 %v565_v33 }
 0x178   : > { %1815 = vmatmul.mubr.f32.gmra.mrb[32].mxu1 %v565_v33  ;;  %1306 = vmatprep.mubr.f32.mxu0 %v570_v34 }
 0x179   : > { %1820 = vmatprep.mubr.f32.mxu1 %v570_v34 }
 0x17b   : > { %1307 = vmatmul.mubr.f32.gmra.mrb[34].mxu0 %v569_v35 }
 0x17c   : > { %1821 = vmatmul.mubr.f32.gmra.mrb[34].mxu1 %v569_v35  ;;  %1312 = vmatprep.mubr.f32.mxu0 %v574_v36 }
 0x17d   : > { %1826 = vmatprep.mubr.f32.mxu1 %v574_v36 }
 0x17f   : > { %1313 = vmatmul.mubr.f32.gmra.mrb[36].mxu0 %v573_v37 }
 0x180   : > { %1827 = vmatmul.mubr.f32.gmra.mrb[36].mxu1 %v573_v37  ;;  %1318 = vmatprep.mubr.f32.mxu0 %v578_v38 }
 0x181   : > { %1832 = vmatprep.mubr.f32.mxu1 %v578_v38 }
 0x183   : > { %1319 = vmatmul.mubr.f32.gmra.mrb[38].mxu0 %v577_v39 }
 0x184   : > { %1833 = vmatmul.mubr.f32.gmra.mrb[38].mxu1 %v577_v39  ;;  %1324 = vmatprep.mubr.f32.mxu0 %v582_v40 }
 0x185   : > { %1838 = vmatprep.mubr.f32.mxu1 %v582_v40 }
 0x187   : > { %1325 = vmatmul.mubr.f32.gmra.mrb[40].mxu0 %v581_v41 }
 0x188   : > { %1839 = vmatmul.mubr.f32.gmra.mrb[40].mxu1 %v581_v41  ;;  %1330 = vmatprep.mubr.f32.mxu0 %v586_v42 }
 0x189   : > { %1844 = vmatprep.mubr.f32.mxu1 %v586_v42 }
 0x18b   : > { %1331 = vmatmul.mubr.f32.gmra.mrb[42].mxu0 %v585_v43 }
 0x18c   : > { %1845 = vmatmul.mubr.f32.gmra.mrb[42].mxu1 %v585_v43  ;;  %1336 = vmatprep.mubr.f32.mxu0 %v590_v44 }
 0x18d   : > { %1850 = vmatprep.mubr.f32.mxu1 %v590_v44 }
 0x18f   : > { %1337 = vmatmul.mubr.f32.gmra.mrb[44].mxu0 %v589_v45 }
 0x190   : > { %1851 = vmatmul.mubr.f32.gmra.mrb[44].mxu1 %v589_v45  ;;  %1342 = vmatprep.mubr.f32.mxu0 %v594_v46 }
 0x191   : > { %1856 = vmatprep.mubr.f32.mxu1 %v594_v46 }
 0x193   : > { %1343 = vmatmul.mubr.f32.gmra.mrb[46].mxu0 %v593_v47 }
 0x194   : > { %1857 = vmatmul.mubr.f32.gmra.mrb[46].mxu1 %v593_v47  ;;  %1348 = vmatprep.mubr.f32.mxu0 %v598_v48 }
 0x195   : > { %1862 = vmatprep.mubr.f32.mxu1 %v598_v48 }
 0x197   : > { %1349 = vmatmul.mubr.f32.gmra.mrb[48].mxu0 %v597_v49 }
 0x198   : > { %1863 = vmatmul.mubr.f32.gmra.mrb[48].mxu1 %v597_v49  ;;  %1354 = vmatprep.mubr.f32.mxu0 %v602_v50 }
 0x199   : > { %1868 = vmatprep.mubr.f32.mxu1 %v602_v50 }
 0x19b   : > { %1355 = vmatmul.mubr.f32.gmra.mrb[50].mxu0 %v601_v51 }
 0x19c   : > { %1869 = vmatmul.mubr.f32.gmra.mrb[50].mxu1 %v601_v51  ;;  %1360 = vmatprep.mubr.f32.mxu0 %v606_v52 }
 0x19d   : > { %1874 = vmatprep.mubr.f32.mxu1 %v606_v52 }
 0x19f   : > { %1361 = vmatmul.mubr.f32.gmra.mrb[52].mxu0 %v605_v53 }
 0x1a0   : > { %1875 = vmatmul.mubr.f32.gmra.mrb[52].mxu1 %v605_v53  ;;  %1366 = vmatprep.mubr.f32.mxu0 %v610_v54 }
 0x1a1   : > { %1880 = vmatprep.mubr.f32.mxu1 %v610_v54 }
 0x1a3   : > { %1367 = vmatmul.mubr.f32.gmra.mrb[54].mxu0 %v609_v55 }
 0x1a4   : > { %1881 = vmatmul.mubr.f32.gmra.mrb[54].mxu1 %v609_v55  ;;  %1372 = vmatprep.mubr.f32.mxu0 %v614_v56 }
 0x1a5   : > { %1886 = vmatprep.mubr.f32.mxu1 %v614_v56 }
 0x1a7   : > { %1373 = vmatmul.mubr.f32.gmra.mrb[56].mxu0 %v613_v57 }
 0x1a8   : > { %1887 = vmatmul.mubr.f32.gmra.mrb[56].mxu1 %v613_v57  ;;  %1378 = vmatprep.mubr.f32.mxu0 %v618_v58 }
 0x1a9   : > { %1892 = vmatprep.mubr.f32.mxu1 %v618_v58 }
 0x1ab   : > { %1379 = vmatmul.mubr.f32.gmra.mrb[58].mxu0 %v617_v59 }
 0x1ac   : > { %1893 = vmatmul.mubr.f32.gmra.mrb[58].mxu1 %v617_v59  ;;  %1384 = vmatprep.mubr.f32.mxu0 %v622_v60 }
 0x1ad   : > { %1898 = vmatprep.mubr.f32.mxu1 %v622_v60 }
 0x1af   : > { %1385 = vmatmul.mubr.f32.gmra.mrb[60].mxu0 %v621_v61 }
 0x1b0   : > { %1899 = vmatmul.mubr.f32.gmra.mrb[60].mxu1 %v621_v61  ;;  %1390 = vmatprep.mubr.f32.mxu0 %v626_v62 }
 0x1b1   : > { %1904 = vmatprep.mubr.f32.mxu1 %v626_v62 }
 0x1b3   : > { %1391 = vmatmul.mubr.f32.gmra.mrb[62].mxu0 %v625_v63 }
 0x1b4   : > { %1905 = vmatmul.mubr.f32.gmra.mrb[62].mxu1 %v625_v63 }
 0x20a   : > { %v1206_v0 = vpop.f32.mrb[0].mxu0 }
 0x20b   : > { %2298 = vst [vmem:[%s3995_s12] sm:$0xff] %v1206_v0  ;;  %v1720_v1 = vpop.f32.mrb[0].mxu1  ;;  %v1208_v2 = vpop.f32.mrb[1].mxu0 }
 0x20c   : > { %2300 = vst [vmem:[%s3995_s12 + $0x10] sm:$0xff] %v1720_v1  ;;  %2299 = vst [vmem:[%s3995_s12 + $0x8] sm:$0xff] %v1208_v2  ;;  %v1722_v3 = vpop.f32.mrb[1].mxu1 }
 0x20d   : > { %2301 = vst [vmem:[%s3995_s12 + $0x18] sm:$0xff] %v1722_v3 }
 0x20e   : > { %v1212_v4 = vpop.f32.mrb[2].mxu0 }
 0x20f   : > { %2302 = vst [vmem:[%s3995_s12 + $0x20] sm:$0xff] %v1212_v4  ;;  %v1726_v5 = vpop.f32.mrb[2].mxu1  ;;  %v1214_v6 = vpop.f32.mrb[3].mxu0 }
 0x210   : > { %2304 = vst [vmem:[%s3995_s12 + $0x30] sm:$0xff] %v1726_v5  ;;  %2303 = vst [vmem:[%s3995_s12 + $0x28] sm:$0xff] %v1214_v6  ;;  %v1728_v7 = vpop.f32.mrb[3].mxu1 }
 0x211   : > { %2305 = vst [vmem:[%s3995_s12 + $0x38] sm:$0xff] %v1728_v7 }
 0x212   : > { %v1218_v8 = vpop.f32.mrb[4].mxu0 }
 0x213   : > { %2306 = vst [vmem:[%s3995_s12 + $0x40] sm:$0xff] %v1218_v8  ;;  %v1732_v9 = vpop.f32.mrb[4].mxu1  ;;  %v1220_v10 = vpop.f32.mrb[5].mxu0 }
 0x214   : > { %2308 = vst [vmem:[%s3995_s12 + $0x50] sm:$0xff] %v1732_v9  ;;  %2307 = vst [vmem:[%s3995_s12 + $0x48] sm:$0xff] %v1220_v10  ;;  %v1734_v11 = vpop.f32.mrb[5].mxu1 }
 0x215   : > { %2309 = vst [vmem:[%s3995_s12 + $0x58] sm:$0xff] %v1734_v11 }
 0x216   : > { %v1224_v12 = vpop.f32.mrb[6].mxu0 }
 0x217   : > { %2310 = vst [vmem:[%s3995_s12 + $0x60] sm:$0xff] %v1224_v12  ;;  %v1738_v13 = vpop.f32.mrb[6].mxu1  ;;  %v1226_v14 = vpop.f32.mrb[7].mxu0 }
 0x218   : > { %2312 = vst [vmem:[%s3995_s12 + $0x70] sm:$0xff] %v1738_v13  ;;  %2311 = vst [vmem:[%s3995_s12 + $0x68] sm:$0xff] %v1226_v14  ;;  %v1740_v15 = vpop.f32.mrb[7].mxu1 }
 0x219   : > { %2313 = vst [vmem:[%s3995_s12 + $0x78] sm:$0xff] %v1740_v15 }
 0x21a   : > { %v1230_v16 = vpop.f32.mrb[8].mxu0 }
 0x21b   : > { %2314 = vst [vmem:[%s3995_s12 + $0x80] sm:$0xff] %v1230_v16  ;;  %v1744_v17 = vpop.f32.mrb[8].mxu1  ;;  %v1232_v18 = vpop.f32.mrb[9].mxu0 }
 0x21c   : > { %2316 = vst [vmem:[%s3995_s12 + $0x90] sm:$0xff] %v1744_v17  ;;  %2315 = vst [vmem:[%s3995_s12 + $0x88] sm:$0xff] %v1232_v18  ;;  %v1746_v19 = vpop.f32.mrb[9].mxu1 }
 0x21d   : > { %2317 = vst [vmem:[%s3995_s12 + $0x98] sm:$0xff] %v1746_v19 }
 0x21e   : > { %v1236_v20 = vpop.f32.mrb[10].mxu0 }
 0x21f   : > { %2318 = vst [vmem:[%s3995_s12 + $0xa0] sm:$0xff] %v1236_v20  ;;  %v1750_v21 = vpop.f32.mrb[10].mxu1  ;;  %v1238_v22 = vpop.f32.mrb[11].mxu0 }
 0x220   : > { %2320 = vst [vmem:[%s3995_s12 + $0xb0] sm:$0xff] %v1750_v21  ;;  %2319 = vst [vmem:[%s3995_s12 + $0xa8] sm:$0xff] %v1238_v22  ;;  %v1752_v23 = vpop.f32.mrb[11].mxu1 }
 0x221   : > { %2321 = vst [vmem:[%s3995_s12 + $0xb8] sm:$0xff] %v1752_v23 }
 0x222   : > { %v1242_v24 = vpop.f32.mrb[12].mxu0 }
 0x223   : > { %2322 = vst [vmem:[%s3995_s12 + $0xc0] sm:$0xff] %v1242_v24  ;;  %v1756_v25 = vpop.f32.mrb[12].mxu1  ;;  %v1244_v26 = vpop.f32.mrb[13].mxu0 }
 0x224   : > { %2324 = vst [vmem:[%s3995_s12 + $0xd0] sm:$0xff] %v1756_v25  ;;  %2323 = vst [vmem:[%s3995_s12 + $0xc8] sm:$0xff] %v1244_v26  ;;  %v1758_v27 = vpop.f32.mrb[13].mxu1 }
 0x225   : > { %2325 = vst [vmem:[%s3995_s12 + $0xd8] sm:$0xff] %v1758_v27 }
 0x226   : > { %v1248_v28 = vpop.f32.mrb[14].mxu0 }
 0x227   : > { %2326 = vst [vmem:[%s3995_s12 + $0xe0] sm:$0xff] %v1248_v28  ;;  %v1762_v29 = vpop.f32.mrb[14].mxu1  ;;  %v1250_v30 = vpop.f32.mrb[15].mxu0 }
 0x228   : > { %2328 = vst [vmem:[%s3995_s12 + $0xf0] sm:$0xff] %v1762_v29  ;;  %2327 = vst [vmem:[%s3995_s12 + $0xe8] sm:$0xff] %v1250_v30  ;;  %v1764_v31 = vpop.f32.mrb[15].mxu1 }
 0x229   : > { %2329 = vst [vmem:[%s3995_s12 + $0xf8] sm:$0xff] %v1764_v31 }
 0x22a   : > { %v1254_v32 = vpop.f32.mrb[16].mxu0 }
 0x22b   : > { %2330 = vst [vmem:[%s3995_s12 + $0x100] sm:$0xff] %v1254_v32  ;;  %v1768_v33 = vpop.f32.mrb[16].mxu1  ;;  %v1256_v34 = vpop.f32.mrb[17].mxu0 }
 0x22c   : > { %2332 = vst [vmem:[%s3995_s12 + $0x110] sm:$0xff] %v1768_v33  ;;  %2331 = vst [vmem:[%s3995_s12 + $0x108] sm:$0xff] %v1256_v34  ;;  %v1770_v35 = vpop.f32.mrb[17].mxu1 }
 0x22d   : > { %2333 = vst [vmem:[%s3995_s12 + $0x118] sm:$0xff] %v1770_v35 }
 0x22e   : > { %v1260_v36 = vpop.f32.mrb[18].mxu0 }
 0x22f   : > { %2334 = vst [vmem:[%s3995_s12 + $0x120] sm:$0xff] %v1260_v36  ;;  %v1774_v37 = vpop.f32.mrb[18].mxu1  ;;  %v1262_v38 = vpop.f32.mrb[19].mxu0 }
 0x230   : > { %2336 = vst [vmem:[%s3995_s12 + $0x130] sm:$0xff] %v1774_v37  ;;  %2335 = vst [vmem:[%s3995_s12 + $0x128] sm:$0xff] %v1262_v38  ;;  %v1776_v39 = vpop.f32.mrb[19].mxu1 }
 0x231   : > { %2337 = vst [vmem:[%s3995_s12 + $0x138] sm:$0xff] %v1776_v39 }
 0x232   : > { %v1266_v40 = vpop.f32.mrb[20].mxu0 }
 0x233   : > { %2338 = vst [vmem:[%s3995_s12 + $0x140] sm:$0xff] %v1266_v40  ;;  %v1780_v41 = vpop.f32.mrb[20].mxu1  ;;  %v1268_v42 = vpop.f32.mrb[21].mxu0 }
 0x234   : > { %2340 = vst [vmem:[%s3995_s12 + $0x150] sm:$0xff] %v1780_v41  ;;  %2339 = vst [vmem:[%s3995_s12 + $0x148] sm:$0xff] %v1268_v42  ;;  %v1782_v43 = vpop.f32.mrb[21].mxu1 }
 0x235   : > { %2341 = vst [vmem:[%s3995_s12 + $0x158] sm:$0xff] %v1782_v43 }
 0x236   : > { %v1272_v44 = vpop.f32.mrb[22].mxu0 }
 0x237   : > { %2342 = vst [vmem:[%s3995_s12 + $0x160] sm:$0xff] %v1272_v44  ;;  %v1786_v45 = vpop.f32.mrb[22].mxu1  ;;  %v1274_v46 = vpop.f32.mrb[23].mxu0 }
 0x238   : > { %2344 = vst [vmem:[%s3995_s12 + $0x170] sm:$0xff] %v1786_v45  ;;  %2343 = vst [vmem:[%s3995_s12 + $0x168] sm:$0xff] %v1274_v46  ;;  %v1788_v47 = vpop.f32.mrb[23].mxu1 }
 0x239   : > { %2345 = vst [vmem:[%s3995_s12 + $0x178] sm:$0xff] %v1788_v47 }
 0x23a   : > { %v1278_v48 = vpop.f32.mrb[24].mxu0 }
 0x23b   : > { %2346 = vst [vmem:[%s3995_s12 + $0x180] sm:$0xff] %v1278_v48  ;;  %v1792_v49 = vpop.f32.mrb[24].mxu1  ;;  %v1280_v50 = vpop.f32.mrb[25].mxu0 }
 0x23c   : > { %2348 = vst [vmem:[%s3995_s12 + $0x190] sm:$0xff] %v1792_v49  ;;  %2347 = vst [vmem:[%s3995_s12 + $0x188] sm:$0xff] %v1280_v50  ;;  %v1794_v51 = vpop.f32.mrb[25].mxu1 }
 0x23d   : > { %2349 = vst [vmem:[%s3995_s12 + $0x198] sm:$0xff] %v1794_v51 }
 0x23e   : > { %v1284_v52 = vpop.f32.mrb[26].mxu0 }
 0x23f   : > { %2350 = vst [vmem:[%s3995_s12 + $0x1a0] sm:$0xff] %v1284_v52  ;;  %v1798_v53 = vpop.f32.mrb[26].mxu1  ;;  %v1286_v54 = vpop.f32.mrb[27].mxu0 }
 0x240   : > { %2352 = vst [vmem:[%s3995_s12 + $0x1b0] sm:$0xff] %v1798_v53  ;;  %2351 = vst [vmem:[%s3995_s12 + $0x1a8] sm:$0xff] %v1286_v54  ;;  %v1800_v55 = vpop.f32.mrb[27].mxu1 }
 0x241   : > { %2353 = vst [vmem:[%s3995_s12 + $0x1b8] sm:$0xff] %v1800_v55 }
 0x242   : > { %v1290_v56 = vpop.f32.mrb[28].mxu0 }
 0x243   : > { %2354 = vst [vmem:[%s3995_s12 + $0x1c0] sm:$0xff] %v1290_v56  ;;  %v1804_v57 = vpop.f32.mrb[28].mxu1  ;;  %v1292_v58 = vpop.f32.mrb[29].mxu0 }
 0x244   : > { %2356 = vst [vmem:[%s3995_s12 + $0x1d0] sm:$0xff] %v1804_v57  ;;  %2355 = vst [vmem:[%s3995_s12 + $0x1c8] sm:$0xff] %v1292_v58  ;;  %v1806_v59 = vpop.f32.mrb[29].mxu1 }
 0x245   : > { %2357 = vst [vmem:[%s3995_s12 + $0x1d8] sm:$0xff] %v1806_v59 }
 0x246   : > { %v1296_v60 = vpop.f32.mrb[30].mxu0 }
 0x247   : > { %2358 = vst [vmem:[%s3995_s12 + $0x1e0] sm:$0xff] %v1296_v60  ;;  %v1810_v61 = vpop.f32.mrb[30].mxu1  ;;  %v1298_v62 = vpop.f32.mrb[31].mxu0 }
 0x248   : > { %2360 = vst [vmem:[%s3995_s12 + $0x1f0] sm:$0xff] %v1810_v61  ;;  %2359 = vst [vmem:[%s3995_s12 + $0x1e8] sm:$0xff] %v1298_v62  ;;  %v1812_v63 = vpop.f32.mrb[31].mxu1 }
 0x249   : > { %2361 = vst [vmem:[%s3995_s12 + $0x1f8] sm:$0xff] %v1812_v63 }
 0x24a   : > { %v1302_v0 = vpop.f32.mrb[32].mxu0 }
 0x24b   : > { %2362 = vst [vmem:[%s3995_s12 + $0x200] sm:$0xff] %v1302_v0  ;;  %v1816_v1 = vpop.f32.mrb[32].mxu1  ;;  %v1304_v2 = vpop.f32.mrb[33].mxu0 }
 0x24c   : > { %2364 = vst [vmem:[%s3995_s12 + $0x210] sm:$0xff] %v1816_v1  ;;  %2363 = vst [vmem:[%s3995_s12 + $0x208] sm:$0xff] %v1304_v2  ;;  %v1818_v3 = vpop.f32.mrb[33].mxu1 }
 0x24d   : > { %2365 = vst [vmem:[%s3995_s12 + $0x218] sm:$0xff] %v1818_v3 }
 0x24e   : > { %v1308_v4 = vpop.f32.mrb[34].mxu0 }
 0x24f   : > { %2366 = vst [vmem:[%s3995_s12 + $0x220] sm:$0xff] %v1308_v4  ;;  %v1822_v5 = vpop.f32.mrb[34].mxu1  ;;  %v1310_v6 = vpop.f32.mrb[35].mxu0 }
 0x250   : > { %2368 = vst [vmem:[%s3995_s12 + $0x230] sm:$0xff] %v1822_v5  ;;  %2367 = vst [vmem:[%s3995_s12 + $0x228] sm:$0xff] %v1310_v6  ;;  %v1824_v7 = vpop.f32.mrb[35].mxu1 }
 0x251   : > { %2369 = vst [vmem:[%s3995_s12 + $0x238] sm:$0xff] %v1824_v7 }
 0x252   : > { %v1314_v8 = vpop.f32.mrb[36].mxu0 }
 0x253   : > { %2370 = vst [vmem:[%s3995_s12 + $0x240] sm:$0xff] %v1314_v8  ;;  %v1828_v9 = vpop.f32.mrb[36].mxu1  ;;  %v1316_v10 = vpop.f32.mrb[37].mxu0 }
 0x254   : > { %2372 = vst [vmem:[%s3995_s12 + $0x250] sm:$0xff] %v1828_v9  ;;  %2371 = vst [vmem:[%s3995_s12 + $0x248] sm:$0xff] %v1316_v10  ;;  %v1830_v11 = vpop.f32.mrb[37].mxu1 }
 0x255   : > { %2373 = vst [vmem:[%s3995_s12 + $0x258] sm:$0xff] %v1830_v11 }
 0x256   : > { %v1320_v12 = vpop.f32.mrb[38].mxu0 }
 0x257   : > { %2374 = vst [vmem:[%s3995_s12 + $0x260] sm:$0xff] %v1320_v12  ;;  %v1834_v13 = vpop.f32.mrb[38].mxu1  ;;  %v1322_v14 = vpop.f32.mrb[39].mxu0 }
 0x258   : > { %2376 = vst [vmem:[%s3995_s12 + $0x270] sm:$0xff] %v1834_v13  ;;  %2375 = vst [vmem:[%s3995_s12 + $0x268] sm:$0xff] %v1322_v14  ;;  %v1836_v15 = vpop.f32.mrb[39].mxu1 }
 0x259   : > { %2377 = vst [vmem:[%s3995_s12 + $0x278] sm:$0xff] %v1836_v15 }
 0x25a   : > { %v1326_v16 = vpop.f32.mrb[40].mxu0 }
 0x25b   : > { %2378 = vst [vmem:[%s3995_s12 + $0x280] sm:$0xff] %v1326_v16  ;;  %v1840_v17 = vpop.f32.mrb[40].mxu1  ;;  %v1328_v18 = vpop.f32.mrb[41].mxu0 }
 0x25c   : > { %2380 = vst [vmem:[%s3995_s12 + $0x290] sm:$0xff] %v1840_v17  ;;  %2379 = vst [vmem:[%s3995_s12 + $0x288] sm:$0xff] %v1328_v18  ;;  %v1842_v19 = vpop.f32.mrb[41].mxu1 }
 0x25d   : > { %2381 = vst [vmem:[%s3995_s12 + $0x298] sm:$0xff] %v1842_v19 }
 0x25e   : > { %v1332_v20 = vpop.f32.mrb[42].mxu0 }
 0x25f   : > { %2382 = vst [vmem:[%s3995_s12 + $0x2a0] sm:$0xff] %v1332_v20  ;;  %v1846_v21 = vpop.f32.mrb[42].mxu1  ;;  %v1334_v22 = vpop.f32.mrb[43].mxu0 }
 0x260   : > { %2384 = vst [vmem:[%s3995_s12 + $0x2b0] sm:$0xff] %v1846_v21  ;;  %2383 = vst [vmem:[%s3995_s12 + $0x2a8] sm:$0xff] %v1334_v22  ;;  %v1848_v23 = vpop.f32.mrb[43].mxu1 }
 0x261   : > { %2385 = vst [vmem:[%s3995_s12 + $0x2b8] sm:$0xff] %v1848_v23 }
 0x262   : > { %v1338_v24 = vpop.f32.mrb[44].mxu0 }
 0x263   : > { %2386 = vst [vmem:[%s3995_s12 + $0x2c0] sm:$0xff] %v1338_v24  ;;  %v1852_v25 = vpop.f32.mrb[44].mxu1  ;;  %v1340_v26 = vpop.f32.mrb[45].mxu0 }
 0x264   : > { %2388 = vst [vmem:[%s3995_s12 + $0x2d0] sm:$0xff] %v1852_v25  ;;  %2387 = vst [vmem:[%s3995_s12 + $0x2c8] sm:$0xff] %v1340_v26  ;;  %v1854_v27 = vpop.f32.mrb[45].mxu1 }
 0x265   : > { %2389 = vst [vmem:[%s3995_s12 + $0x2d8] sm:$0xff] %v1854_v27 }
 0x266   : > { %v1344_v28 = vpop.f32.mrb[46].mxu0 }
 0x267   : > { %2390 = vst [vmem:[%s3995_s12 + $0x2e0] sm:$0xff] %v1344_v28  ;;  %v1858_v29 = vpop.f32.mrb[46].mxu1  ;;  %v1346_v30 = vpop.f32.mrb[47].mxu0 }
 0x268   : > { %2392 = vst [vmem:[%s3995_s12 + $0x2f0] sm:$0xff] %v1858_v29  ;;  %2391 = vst [vmem:[%s3995_s12 + $0x2e8] sm:$0xff] %v1346_v30  ;;  %v1860_v31 = vpop.f32.mrb[47].mxu1 }
 0x269   : > { %2393 = vst [vmem:[%s3995_s12 + $0x2f8] sm:$0xff] %v1860_v31 }
 0x26a   : > { %v1350_v32 = vpop.f32.mrb[48].mxu0 }
 0x26b   : > { %2394 = vst [vmem:[%s3995_s12 + $0x300] sm:$0xff] %v1350_v32  ;;  %v1864_v33 = vpop.f32.mrb[48].mxu1  ;;  %v1352_v34 = vpop.f32.mrb[49].mxu0 }
 0x26c   : > { %2396 = vst [vmem:[%s3995_s12 + $0x310] sm:$0xff] %v1864_v33  ;;  %2395 = vst [vmem:[%s3995_s12 + $0x308] sm:$0xff] %v1352_v34  ;;  %v1866_v35 = vpop.f32.mrb[49].mxu1 }
 0x26d   : > { %2397 = vst [vmem:[%s3995_s12 + $0x318] sm:$0xff] %v1866_v35 }
 0x26e   : > { %v1356_v36 = vpop.f32.mrb[50].mxu0 }
 0x26f   : > { %2398 = vst [vmem:[%s3995_s12 + $0x320] sm:$0xff] %v1356_v36  ;;  %v1870_v37 = vpop.f32.mrb[50].mxu1  ;;  %v1358_v38 = vpop.f32.mrb[51].mxu0 }
 0x270   : > { %2400 = vst [vmem:[%s3995_s12 + $0x330] sm:$0xff] %v1870_v37  ;;  %2399 = vst [vmem:[%s3995_s12 + $0x328] sm:$0xff] %v1358_v38  ;;  %v1872_v39 = vpop.f32.mrb[51].mxu1 }
 0x271   : > { %2401 = vst [vmem:[%s3995_s12 + $0x338] sm:$0xff] %v1872_v39 }
 0x272   : > { %v1362_v40 = vpop.f32.mrb[52].mxu0 }
 0x273   : > { %2402 = vst [vmem:[%s3995_s12 + $0x340] sm:$0xff] %v1362_v40  ;;  %v1876_v41 = vpop.f32.mrb[52].mxu1  ;;  %v1364_v42 = vpop.f32.mrb[53].mxu0 }
 0x274   : > { %2404 = vst [vmem:[%s3995_s12 + $0x350] sm:$0xff] %v1876_v41  ;;  %2403 = vst [vmem:[%s3995_s12 + $0x348] sm:$0xff] %v1364_v42  ;;  %v1878_v43 = vpop.f32.mrb[53].mxu1 }
 0x275   : > { %2405 = vst [vmem:[%s3995_s12 + $0x358] sm:$0xff] %v1878_v43 }
 0x276   : > { %v1368_v44 = vpop.f32.mrb[54].mxu0 }
 0x277   : > { %2406 = vst [vmem:[%s3995_s12 + $0x360] sm:$0xff] %v1368_v44  ;;  %v1882_v45 = vpop.f32.mrb[54].mxu1  ;;  %v1370_v46 = vpop.f32.mrb[55].mxu0 }
 0x278   : > { %2408 = vst [vmem:[%s3995_s12 + $0x370] sm:$0xff] %v1882_v45  ;;  %2407 = vst [vmem:[%s3995_s12 + $0x368] sm:$0xff] %v1370_v46  ;;  %v1884_v47 = vpop.f32.mrb[55].mxu1 }
 0x279   : > { %2409 = vst [vmem:[%s3995_s12 + $0x378] sm:$0xff] %v1884_v47 }
 0x27a   : > { %v1374_v48 = vpop.f32.mrb[56].mxu0 }
 0x27b   : > { %2410 = vst [vmem:[%s3995_s12 + $0x380] sm:$0xff] %v1374_v48  ;;  %v1888_v49 = vpop.f32.mrb[56].mxu1  ;;  %v1376_v50 = vpop.f32.mrb[57].mxu0 }
 0x27c   : > { %2412 = vst [vmem:[%s3995_s12 + $0x390] sm:$0xff] %v1888_v49  ;;  %2411 = vst [vmem:[%s3995_s12 + $0x388] sm:$0xff] %v1376_v50  ;;  %v1890_v51 = vpop.f32.mrb[57].mxu1 }
 0x27d   : > { %2413 = vst [vmem:[%s3995_s12 + $0x398] sm:$0xff] %v1890_v51 }
 0x27e   : > { %v1380_v52 = vpop.f32.mrb[58].mxu0 }
 0x27f   : > { %2414 = vst [vmem:[%s3995_s12 + $0x3a0] sm:$0xff] %v1380_v52  ;;  %v1894_v53 = vpop.f32.mrb[58].mxu1  ;;  %v1382_v54 = vpop.f32.mrb[59].mxu0 }
 0x280   : > { %2416 = vst [vmem:[%s3995_s12 + $0x3b0] sm:$0xff] %v1894_v53  ;;  %2415 = vst [vmem:[%s3995_s12 + $0x3a8] sm:$0xff] %v1382_v54  ;;  %v1896_v55 = vpop.f32.mrb[59].mxu1 }
 0x281   : > { %2417 = vst [vmem:[%s3995_s12 + $0x3b8] sm:$0xff] %v1896_v55 }
 0x282   : > { %v1386_v56 = vpop.f32.mrb[60].mxu0 }
 0x283   : > { %2418 = vst [vmem:[%s3995_s12 + $0x3c0] sm:$0xff] %v1386_v56  ;;  %v1900_v57 = vpop.f32.mrb[60].mxu1  ;;  %v1388_v58 = vpop.f32.mrb[61].mxu0 }
 0x284   : > { %2420 = vst [vmem:[%s3995_s12 + $0x3d0] sm:$0xff] %v1900_v57  ;;  %2419 = vst [vmem:[%s3995_s12 + $0x3c8] sm:$0xff] %v1388_v58  ;;  %v1902_v59 = vpop.f32.mrb[61].mxu1 }
 0x285   : > { %2421 = vst [vmem:[%s3995_s12 + $0x3d8] sm:$0xff] %v1902_v59 }
 0x286   : > { %v1392_v60 = vpop.f32.mrb[62].mxu0 }
 0x287   : > { %2422 = vst [vmem:[%s3995_s12 + $0x3e0] sm:$0xff] %v1392_v60  ;;  %v1906_v61 = vpop.f32.mrb[62].mxu1  ;;  %v1394_v62 = vpop.f32.mrb[63].mxu0 }
 0x288   : > { %2424 = vst [vmem:[%s3995_s12 + $0x3f0] sm:$0xff] %v1906_v61  ;;  %2423 = vst [vmem:[%s3995_s12 + $0x3e8] sm:$0xff] %v1394_v62  ;;  %v1908_v63 = vpop.f32.mrb[63].mxu1 }
 0x289   : > { %2425 = vst [vmem:[%s3995_s12 + $0x3f8] sm:$0xff] %v1908_v63 }
 0x28a   : > { %3182 = shalt.err (!%p3179_p11)
}
 0x28b   : > { %s3183_s28 = scalar_lea.hbm %s4127_s23, 16384  ;;  %s3187_s26 = scalar_lea.hbm %s4258_s8, 245760 }
 0x28c   : > { %p3184_p2 = scmp.ne.s32.totalorder %s4127_s23, %s3183_s28  ;;  %p3188_p7 = scmp.lt.u32.totalorder %s4127_s23, %s4258_s8 }
 0x28d   : > { %p3189_p13 = scmp.lt.u32.totalorder %s3187_s26, %s3183_s28  ;;  %p3191_p1 = scmp.lt.u32.totalorder %s3183_s28, %s4127_s23 }
 0x28e   : > { %p3185_p5 = pnand %p3184_p2, %p4259_p12 }
 0x28f   : > { %p3190_p6 = por %p3189_p13, %p3188_p7 }
 0x290   : > { %p3186_p3 = pneg %p3185_p5 }
 0x291   : > { %p3192_p9 = por %p3191_p1, %p3190_p6 }
 0x293   : > { %p3193_p0 = pnand %p3192_p9, %p3186_p3 }
 0x295   : > { %3196 = shalt.err (!%p3193_p0)
}
 0x296   : > { %s3327_s19 = smov 512   ;;  %s3328_s4 = smov 1536  }
 0x297   : > { %s3329_s15 = smov 32  }
 0x298   : > { %2976 = dma.vmem_to_hbm [thread:$0]  (%p4259_p12), %s4129_s18, 16384, %s4127_s23, %s4137_s5, %s3327_s19, %s3328_s4, %s3329_s15  }
 0x299 PF: > { %p2990_p4 = scmp.ge.s32.totalorder %s3319_s22, 2  ;;  %s2458_s25 = sand.u32 1, %s3267_s9  }
 0x29a   : > { %p4260_p10 = scmp.ne.s32.totalorder %s4249_s27, 0  ;;  %s2459_s2 = scalar_lea.sflag [#allocation5], %s2458_s25 }
 0x29c   : > { %p2986_p8 = pnand %p2990_p4, %p4260_p10 }
 0x29e   : > { %3262 = dma.done.wait (!%p2986_p8), %s2459_s2, 16384  }
 0x29f   : > { %3264 = vsyncadd (!%p2986_p8), %s2459_s2, 4294950912  ;;  %s21_s22 = sadd.s32 1, %s3319_s22   ;;  %s4262_s18 = sld [smem:[#allocation16_spill]] }
 0x2a0   : > { %p4166_p11 = scmp.ge.s32.totalorder %s21_s22, 17   ;;  %s4263_s19 = sld [smem:[#allocation13_spill]] }
 0x2a1   : > { %s4264_s27 = sld [smem:[#allocation14_spill]]  ;;  %s4265_s21 = sld [smem:[#allocation15_spill]] }
 0x2a2   : > { %s4266_s9 = smov %s3271_s10  ;;  %s4267_s10 = smov %s3275_s11 }
 0x2a3   : > { %s4268_s11 = smov %s3539_s30  ;;  %s4269_s12 = smov %s3283_s13 }
 0x2a4   : > { %s4270_s13 = smov %s3287_s14  ;;  %s4272_s15 = smov %s3295_s16 }
 0x2a5   : > { %s4271_s14 = smov %s4262_s18  ;;  %s4273_s16 = smov %s3299_s17 }
 0x2a6   : > { %s4274_s17 = smov %s3536_s0  ;;  %s4275_s18 = smov %s3311_s20 }
 0x2a7   : > { %s4276_s20 = smov %s4264_s27  ;;  %20 = sbr.rel (!%p4166_p11) target bundleno = 15 (0xf), region = 94 }
 0x2ae   :  { %2464 = vsyncpa [#allocation4], 1 }
 0x2af   :  { %2466 = vsyncpa [#allocation4 + $0x1], 1 }
 0x2b0   :  { %2467 = vsyncpa [#allocation7], 1 }
 0x2b1   :  { %2469 = vsyncpa [#allocation7 + $0x1], 1 }
 0x2b2   :  { %2470 = vsyncpa [#allocation5], 1 }
 0x2b3   :  { %2472 = vsyncpa [#allocation5 + $0x1], 1 }

</bundles_post_ra>
